<compile_context>
chip_gen: v7x
topology: tpu7x:2x2x1
jax: 0.10.0
libtpu: 0.0.40
codegen_flags: <defaults>
</compile_context>

<pallas_src>
import functools
import math

import jax
import jax.numpy as jnp
from jax.experimental import pallas as pl
from jax.experimental.pallas import tpu as pltpu

HIDDEN = 512
SLAB = 128                       # lane-dense output width (multiple of 128)
LOG2PI = math.log(2.0 * math.pi)


def _round_up(x, m):
    return ((x + m - 1) // m) * m


def _tile_spec(tile_b, width):
    # batch-tiled array: block (tile_b, width), marches along the batch axis
    return pl.BlockSpec((tile_b, width), lambda i: (i, 0))


def _const_spec(shape):
    # VMEM-resident parameter: whole array, constant block index across tiles
    return pl.BlockSpec(shape, lambda i: (0, 0))


# ---------------------------------------------------------------------------
# Kernels
# ---------------------------------------------------------------------------
def _eval_kernel(logp_const, logp_col,
                 state_ref, act_ref, invvar_ref,
                 w1_ref, b1_ref,
                 w2a_ref, b2a_ref, w2c_ref, b2c_ref,
                 w3a_ref, w3c_ref, b3_ref,
                 out_ref):
    """Fused actor+critic forward + diagonal-Gaussian log-prob.

    Output slab layout (width SLAB = 128):
      cols [0, A)  : action_mean
      col  A       : state value
      col  A + 1   : log_prob
      cols > A + 1 : zeros
    """
    x = state_ref[...].astype(jnp.bfloat16)

    # shared-LHS fused first layer: (B, S) @ (S, 1024) -> [actor | critic]
    h1 = jnp.dot(x, w1_ref[...], preferred_element_type=jnp.float32) + b1_ref[...]
    h1 = jnp.maximum(h1, 0.0)
    h1a = h1[:, :HIDDEN].astype(jnp.bfloat16)
    h1c = h1[:, HIDDEN:].astype(jnp.bfloat16)

    h2a = jnp.dot(h1a, w2a_ref[...], preferred_element_type=jnp.float32) + b2a_ref[...]
    h2a = jnp.maximum(h2a, 0.0).astype(jnp.bfloat16)
    h2c = jnp.dot(h1c, w2c_ref[...], preferred_element_type=jnp.float32) + b2c_ref[...]
    h2c = jnp.maximum(h2c, 0.0).astype(jnp.bfloat16)

    # lane-dense fused output heads (zero-padded to 128 columns)
    slab = (jnp.dot(h2a, w3a_ref[...], preferred_element_type=jnp.float32)
            + jnp.dot(h2c, w3c_ref[...], preferred_element_type=jnp.float32)
            + b3_ref[...])

    # Mahalanobis term: inv_var is zero outside the first A lanes, so the
    # value / padding columns contribute nothing to the reduction.
    diff = act_ref[...] - slab
    maha = jnp.sum(diff * diff * invvar_ref[...], axis=-1, keepdims=True)
    logp = logp_const - 0.5 * maha

    lane = jax.lax.broadcasted_iota(jnp.int32, slab.shape, 1)
    out_ref[...] = jnp.where(lane == logp_col, logp, slab)


def _act_kernel(state_ref, w1_ref, b1_ref, w2_ref, b2_ref, w3_ref, b3_ref,
                out_ref):
    """Actor-only forward; output is the (B, 128) zero-padded action-mean slab."""
    x = state_ref[...].astype(jnp.bfloat16)
    h = jnp.dot(x, w1_ref[...], preferred_element_type=jnp.float32) + b1_ref[...]
    h = jnp.maximum(h, 0.0).astype(jnp.bfloat16)
    h = jnp.dot(h, w2_ref[...], preferred_element_type=jnp.float32) + b2_ref[...]
    h = jnp.maximum(h, 0.0).astype(jnp.bfloat16)
    out_ref[...] = (jnp.dot(h, w3_ref[...], preferred_element_type=jnp.float32)
                    + b3_ref[...])


# ---------------------------------------------------------------------------
# Module wrapper
# ---------------------------------------------------------------------------
class ActorCriticPallas:
    """JAX/Pallas port of the PyTorch ActorCritic module."""

    def __init__(self, state_dim, action_dim, action_std, key):
        assert action_dim + 2 <= SLAB, "action_dim too large for 128-wide slab"
        self.state_dim = state_dim
        self.action_dim = action_dim

        var = float(action_std) * float(action_std)
        self.action_var = jnp.full((action_dim,), var, jnp.float32)
        logdet = action_dim * math.log(var)
        self._logp_const = -0.5 * (action_dim * LOG2PI + logdet)
        self._entropy_const = 0.5 * action_dim * (1.0 + LOG2PI) + 0.5 * logdet

        ks = jax.random.split(key, 12)

        def init_linear(kw, kb, fan_in, fan_out):
            bound = 1.0 / math.sqrt(fan_in)
            w = jax.random.uniform(kw, (fan_in, fan_out), jnp.float32, -bound, bound)
            b = jax.random.uniform(kb, (1, fan_out), jnp.float32, -bound, bound)
            return w, b

        # f32 master weights (y = x @ W + b)
        self.w1a, self.b1a = init_linear(ks[0], ks[1], state_dim, HIDDEN)
        self.w2a, self.b2a = init_linear(ks[2], ks[3], HIDDEN, HIDDEN)
        self.w3a, self.b3a = init_linear(ks[4], ks[5], HIDDEN, action_dim)
        self.w1c, self.b1c = init_linear(ks[6], ks[7], state_dim, HIDDEN)
        self.w2c, self.b2c = init_linear(ks[8], ks[9], HIDDEN, HIDDEN)
        self.w3c, self.b3c = init_linear(ks[10], ks[11], HIDDEN, 1)

        bf = jnp.bfloat16
        A = action_dim
        # fused / padded bf16 kernel parameters (built once, host-side)
        self._w1_fused = jnp.concatenate([self.w1a, self.w1c], axis=1).astype(bf)
        self._b1_fused = jnp.concatenate([self.b1a, self.b1c], axis=1)
        self._w2a_bf = self.w2a.astype(bf)
        self._w2c_bf = self.w2c.astype(bf)
        self._w3a_pad = (jnp.zeros((HIDDEN, SLAB), jnp.float32)
                         .at[:, :A].set(self.w3a).astype(bf))
        self._w3c_pad = (jnp.zeros((HIDDEN, SLAB), jnp.float32)
                         .at[:, A:A + 1].set(self.w3c).astype(bf))
        self._b3_pad = (jnp.zeros((1, SLAB), jnp.float32)
                        .at[:, :A].set(self.b3a)
                        .at[:, A:A + 1].set(self.b3c))
        self._w1a_bf = self.w1a.astype(bf)
        self._b3a_pad = jnp.zeros((1, SLAB), jnp.float32).at[:, :A].set(self.b3a)
        self._inv_var_pad = (jnp.zeros((1, SLAB), jnp.float32)
                             .at[:, :A].set(1.0 / self.action_var))

        self._eval_jit = jax.jit(self._eval_impl)
        self._actor_jit = jax.jit(self._actor_impl)

    # ------------------------------------------------------------------
    @staticmethod
    def _tile_for(batch):
        return 256 if batch >= 256 else _round_up(max(batch, 8), 8)

    def _eval_impl(self, state, action):
        B = state.shape[0]
        A = self.action_dim
        tile_b = self._tile_for(B)
        b_pad = _round_up(B, tile_b)

        state_p = jnp.pad(state.astype(jnp.float32), ((0, b_pad - B), (0, 0)))
        action_p = jnp.pad(action.astype(jnp.float32),
                           ((0, b_pad - B), (0, SLAB - A)))

        kernel = functools.partial(_eval_kernel, self._logp_const, A + 1)
        in_specs = [
            _tile_spec(tile_b, self.state_dim),           # state tile
            _tile_spec(tile_b, SLAB),                     # padded action tile
            _const_spec(self._inv_var_pad.shape),         # inv_var (padded)
            _const_spec(self._w1_fused.shape), _const_spec(self._b1_fused.shape),
            _const_spec(self._w2a_bf.shape), _const_spec(self.b2a.shape),
            _const_spec(self._w2c_bf.shape), _const_spec(self.b2c.shape),
            _const_spec(self._w3a_pad.shape), _const_spec(self._w3c_pad.shape),
            _const_spec(self._b3_pad.shape),
        ]
        out = pl.pallas_call(
            kernel,
            out_shape=jax.ShapeDtypeStruct((b_pad, SLAB), jnp.float32),
            grid_spec=pltpu.PrefetchScalarGridSpec(
                num_scalar_prefetch=0,
                grid=(b_pad // tile_b,),
                in_specs=in_specs,
                out_specs=_tile_spec(tile_b, SLAB),
            ),
            compiler_params=pltpu.CompilerParams(
                dimension_semantics=("parallel",),
            ),
        )(state_p, action_p, self._inv_var_pad,
          self._w1_fused, self._b1_fused,
          self._w2a_bf, self.b2a, self._w2c_bf, self.b2c,
          self._w3a_pad, self._w3c_pad, self._b3_pad)
        return out[:B]

    def _actor_impl(self, state):
        B = state.shape[0]
        tile_b = self._tile_for(B)
        b_pad = _round_up(B, tile_b)
        state_p = jnp.pad(state.astype(jnp.float32), ((0, b_pad - B), (0, 0)))

        in_specs = [
            _tile_spec(tile_b, self.state_dim),
            _const_spec(self._w1a_bf.shape), _const_spec(self.b1a.shape),
            _const_spec(self._w2a_bf.shape), _const_spec(self.b2a.shape),
            _const_spec(self._w3a_pad.shape), _const_spec(self._b3a_pad.shape),
        ]
        out = pl.pallas_call(
            _act_kernel,
            out_shape=jax.ShapeDtypeStruct((b_pad, SLAB), jnp.float32),
            grid_spec=pltpu.PrefetchScalarGridSpec(
                num_scalar_prefetch=0,
                grid=(b_pad // tile_b,),
                in_specs=in_specs,
                out_specs=_tile_spec(tile_b, SLAB),
            ),
            compiler_params=pltpu.CompilerParams(
                dimension_semantics=("parallel",),
            ),
        )(state_p, self._w1a_bf, self.b1a, self._w2a_bf, self.b2a,
          self._w3a_pad, self._b3a_pad)
        return out[:B, :self.action_dim]

    # ------------------------------------------------------------------
    def evaluate(self, state, action):
        """Mirrors ActorCritic.evaluate(state, action)."""
        if self.action_dim == 1:
            action = action.reshape(-1, self.action_dim)
        A = self.action_dim
        slab = self._eval_jit(state, action)          # (B, 128)
        logp = slab[:, A + 1]                         # (B,)
        values = slab[:, A:A + 1]                     # (B, 1)  (critic head)
        entropy = jnp.full((state.shape[0],), self._entropy_const, jnp.float32)
        return logp, values, entropy

    def act(self, state, key):
        """Mirrors ActorCritic.act(state); sampling done in JAX glue."""
        mean = self._actor_jit(state)                 # actor-only kernel
        mean = jnp.clip(mean, -2.0, 2.0)
        std = jnp.sqrt(self.action_var)
        noise = jax.random.normal(key, mean.shape, jnp.float32)
        action = jnp.clip(mean + noise * std, -2.0, 2.0)
        diff = action - mean
        logp = (-0.5 * jnp.sum(diff * diff / self.action_var, axis=-1)
                + self._logp_const)
        # TODO(synk): original act() prints the action mean and appends it to
        # 'DRL(PPO)_logs/Cavity/Action_mean.txt' -- host-side I/O, not a kernel op.
        return action, logp


# ----------------------------------------------------------------------
def _reference_evaluate(model, state, action):
    """Pure-JAX reference (same bf16-operand / f32-accumulate numerics)."""
    bf = jnp.bfloat16

    def lin(x, w, b):
        return jnp.dot(x.astype(bf), w.astype(bf),
                       preferred_element_type=jnp.float32) + b

    h = jnp.maximum(lin(state, model.w1a, model.b1a), 0.0)
    h = jnp.maximum(lin(h, model.w2a, model.b2a), 0.0)
    mean = lin(h, model.w3a, model.b3a)

    hc = jnp.maximum(lin(state, model.w1c, model.b1c), 0.0)
    hc = jnp.maximum(lin(hc, model.w2c, model.b2c), 0.0)
    value = lin(hc, model.w3c, model.b3c)

    var = model.action_var
    diff = action - mean
    logdet = jnp.sum(jnp.log(var))
    logp = (-0.5 * jnp.sum(diff * diff / var, axis=-1)
            - 0.5 * model.action_dim * LOG2PI - 0.5 * logdet)
    ent = jnp.full((state.shape[0],),
                   0.5 * model.action_dim * (1.0 + LOG2PI) + 0.5 * logdet)
    return logp, value, ent


if __name__ == "__main__":
    key = jax.random.PRNGKey(0)
    k_model, k_state, k_action, k_act = jax.random.split(key, 4)

    B, STATE_DIM, ACTION_DIM, ACTION_STD = 8, 32, 4, 0.5

    model = ActorCriticPallas(STATE_DIM, ACTION_DIM, ACTION_STD, k_model)

    state = jax.random.normal(k_state, (B, STATE_DIM), jnp.float32)
    action = jax.random.normal(k_action, (B, ACTION_DIM), jnp.float32)

    logp, values, entropy = model.evaluate(state, action)
    jax.block_until_ready((logp, values, entropy))

    # correctness check against pure-JAX reference (same mixed precision)
    logp_r, values_r, ent_r = _reference_evaluate(model, state, action)
    assert jnp.allclose(logp, logp_r, atol=5e-3, rtol=5e-3)
    assert jnp.allclose(values, values_r, atol=5e-3, rtol=5e-3)
    assert jnp.allclose(entropy, ent_r, atol=1e-4, rtol=1e-4)

    # exercise the act() path too (actor-only kernel + sampling glue)
    a, alogp = model.act(state, k_act)
    jax.block_until_ready((a, alogp))
    assert a.shape == (B, ACTION_DIM) and alogp.shape == (B,)

    print("KERNEL_OK")
</pallas_src>

<mosaic_0001>
module attributes {stable_mosaic.version = 11 : i64} {
  func.func @_eval_kernel(%arg0: i32, %arg1: memref<8x32xf32, #tpu.memory_space<vmem>>, %arg2: memref<8x128xf32, #tpu.memory_space<vmem>>, %arg3: memref<1x128xf32, #tpu.memory_space<vmem>>, %arg4: memref<32x1024xbf16, #tpu.memory_space<vmem>>, %arg5: memref<1x1024xf32, #tpu.memory_space<vmem>>, %arg6: memref<512x512xbf16, #tpu.memory_space<vmem>>, %arg7: memref<1x512xf32, #tpu.memory_space<vmem>>, %arg8: memref<512x512xbf16, #tpu.memory_space<vmem>>, %arg9: memref<1x512xf32, #tpu.memory_space<vmem>>, %arg10: memref<512x128xbf16, #tpu.memory_space<vmem>>, %arg11: memref<512x128xbf16, #tpu.memory_space<vmem>>, %arg12: memref<1x128xf32, #tpu.memory_space<vmem>>, %arg13: memref<8x128xf32, #tpu.memory_space<vmem>>) attributes {dimension_semantics = [#tpu.dimension_semantics<parallel>], iteration_bounds = array<i64: 1>, scalar_prefetch = 0 : i64, scratch_operands = 0 : i64, tpu.core_type = #tpu.core_type<tc>, window_params = [{transform_indices = @transform_0, window_bounds = array<i64: 8, 32>}, {transform_indices = @transform_1, window_bounds = array<i64: 8, 128>}, {pipeline_mode = #tpu.pipeline_mode<synchronous>, transform_indices = @transform_2, window_bounds = array<i64: 1, 128>}, {pipeline_mode = #tpu.pipeline_mode<synchronous>, transform_indices = @transform_3, window_bounds = array<i64: 32, 1024>}, {pipeline_mode = #tpu.pipeline_mode<synchronous>, transform_indices = @transform_4, window_bounds = array<i64: 1, 1024>}, {pipeline_mode = #tpu.pipeline_mode<synchronous>, transform_indices = @transform_5, window_bounds = array<i64: 512, 512>}, {pipeline_mode = #tpu.pipeline_mode<synchronous>, transform_indices = @transform_6, window_bounds = array<i64: 1, 512>}, {pipeline_mode = #tpu.pipeline_mode<synchronous>, transform_indices = @transform_7, window_bounds = array<i64: 512, 512>}, {pipeline_mode = #tpu.pipeline_mode<synchronous>, transform_indices = @transform_8, window_bounds = array<i64: 1, 512>}, {pipeline_mode = #tpu.pipeline_mode<synchronous>, transform_indices = @transform_9, window_bounds = array<i64: 512, 128>}, {pipeline_mode = #tpu.pipeline_mode<synchronous>, transform_indices = @transform_10, window_bounds = array<i64: 512, 128>}, {pipeline_mode = #tpu.pipeline_mode<synchronous>, transform_indices = @transform_11, window_bounds = array<i64: 1, 128>}, {transform_indices = @transform_12, window_bounds = array<i64: 8, 128>}]} {
    %c0 = arith.constant 0 : index
    %c0_0 = arith.constant 0 : index
    %0 = vector.load %arg1[%c0, %c0_0] : memref<8x32xf32, #tpu.memory_space<vmem>>, vector<8x32xf32>
    %1 = arith.truncf %0 : vector<8x32xf32> to vector<8x32xbf16>
    %c0_1 = arith.constant 0 : index
    %c0_2 = arith.constant 0 : index
    %2 = vector.load %arg4[%c0_1, %c0_2] : memref<32x1024xbf16, #tpu.memory_space<vmem>>, vector<32x1024xbf16>
    %cst = arith.constant dense<0.000000e+00> : vector<8x1024xf32>
    %3 = tpu.matmul %1, %2, %cst {dimension_numbers = #tpu.dot_dimension_numbers<[1], [0], [0], [1], [0, 0, 1, 1], [], []>} : vector<8x32xbf16>, vector<32x1024xbf16>, vector<8x1024xf32> -> vector<8x1024xf32>
    %c0_3 = arith.constant 0 : index
    %c0_4 = arith.constant 0 : index
    %4 = vector.load %arg5[%c0_3, %c0_4] : memref<1x1024xf32, #tpu.memory_space<vmem>>, vector<1x1024xf32>
    %5 = vector.broadcast %4 : vector<1x1024xf32> to vector<8x1024xf32>
    %6 = arith.addf %3, %5 : vector<8x1024xf32>
    %cst_5 = arith.constant 0.000000e+00 : f32
    %7 = vector.broadcast %cst_5 : f32 to vector<8x1024xf32>
    %8 = arith.maximumf %6, %7 : vector<8x1024xf32>
    %9 = vector.extract_strided_slice %8 {offsets = [0, 0], sizes = [8, 512], strides = [1, 1]} : vector<8x1024xf32> to vector<8x512xf32>
    %10 = arith.truncf %9 : vector<8x512xf32> to vector<8x512xbf16>
    %11 = vector.extract_strided_slice %8 {offsets = [0, 512], sizes = [8, 512], strides = [1, 1]} : vector<8x1024xf32> to vector<8x512xf32>
    %12 = arith.truncf %11 : vector<8x512xf32> to vector<8x512xbf16>
    %c0_6 = arith.constant 0 : index
    %c0_7 = arith.constant 0 : index
    %13 = vector.load %arg6[%c0_6, %c0_7] : memref<512x512xbf16, #tpu.memory_space<vmem>>, vector<512x512xbf16>
    %cst_8 = arith.constant dense<0.000000e+00> : vector<8x512xf32>
    %14 = tpu.matmul %10, %13, %cst_8 {dimension_numbers = #tpu.dot_dimension_numbers<[1], [0], [0], [1], [0, 0, 1, 1], [], []>} : vector<8x512xbf16>, vector<512x512xbf16>, vector<8x512xf32> -> vector<8x512xf32>
    %c0_9 = arith.constant 0 : index
    %c0_10 = arith.constant 0 : index
    %15 = vector.load %arg7[%c0_9, %c0_10] : memref<1x512xf32, #tpu.memory_space<vmem>>, vector<1x512xf32>
    %16 = vector.broadcast %15 : vector<1x512xf32> to vector<8x512xf32>
    %17 = arith.addf %14, %16 : vector<8x512xf32>
    %cst_11 = arith.constant 0.000000e+00 : f32
    %18 = vector.broadcast %cst_11 : f32 to vector<8x512xf32>
    %19 = arith.maximumf %17, %18 : vector<8x512xf32>
    %20 = arith.truncf %19 : vector<8x512xf32> to vector<8x512xbf16>
    %c0_12 = arith.constant 0 : index
    %c0_13 = arith.constant 0 : index
    %21 = vector.load %arg8[%c0_12, %c0_13] : memref<512x512xbf16, #tpu.memory_space<vmem>>, vector<512x512xbf16>
    %cst_14 = arith.constant dense<0.000000e+00> : vector<8x512xf32>
    %22 = tpu.matmul %12, %21, %cst_14 {dimension_numbers = #tpu.dot_dimension_numbers<[1], [0], [0], [1], [0, 0, 1, 1], [], []>} : vector<8x512xbf16>, vector<512x512xbf16>, vector<8x512xf32> -> vector<8x512xf32>
    %c0_15 = arith.constant 0 : index
    %c0_16 = arith.constant 0 : index
    %23 = vector.load %arg9[%c0_15, %c0_16] : memref<1x512xf32, #tpu.memory_space<vmem>>, vector<1x512xf32>
    %24 = vector.broadcast %23 : vector<1x512xf32> to vector<8x512xf32>
    %25 = arith.addf %22, %24 : vector<8x512xf32>
    %cst_17 = arith.constant 0.000000e+00 : f32
    %26 = vector.broadcast %cst_17 : f32 to vector<8x512xf32>
    %27 = arith.maximumf %25, %26 : vector<8x512xf32>
    %28 = arith.truncf %27 : vector<8x512xf32> to vector<8x512xbf16>
    %c0_18 = arith.constant 0 : index
    %c0_19 = arith.constant 0 : index
    %29 = vector.load %arg10[%c0_18, %c0_19] : memref<512x128xbf16, #tpu.memory_space<vmem>>, vector<512x128xbf16>
    %cst_20 = arith.constant dense<0.000000e+00> : vector<8x128xf32>
    %30 = tpu.matmul %20, %29, %cst_20 {dimension_numbers = #tpu.dot_dimension_numbers<[1], [0], [0], [1], [0, 0, 1, 1], [], []>} : vector<8x512xbf16>, vector<512x128xbf16>, vector<8x128xf32> -> vector<8x128xf32>
    %c0_21 = arith.constant 0 : index
    %c0_22 = arith.constant 0 : index
    %31 = vector.load %arg11[%c0_21, %c0_22] : memref<512x128xbf16, #tpu.memory_space<vmem>>, vector<512x128xbf16>
    %cst_23 = arith.constant dense<0.000000e+00> : vector<8x128xf32>
    %32 = tpu.matmul %28, %31, %cst_23 {dimension_numbers = #tpu.dot_dimension_numbers<[1], [0], [0], [1], [0, 0, 1, 1], [], []>} : vector<8x512xbf16>, vector<512x128xbf16>, vector<8x128xf32> -> vector<8x128xf32>
    %33 = arith.addf %30, %32 : vector<8x128xf32>
    %c0_24 = arith.constant 0 : index
    %c0_25 = arith.constant 0 : index
    %34 = vector.load %arg12[%c0_24, %c0_25] : memref<1x128xf32, #tpu.memory_space<vmem>>, vector<1x128xf32>
    %35 = vector.broadcast %34 : vector<1x128xf32> to vector<8x128xf32>
    %36 = arith.addf %33, %35 : vector<8x128xf32>
    %c0_26 = arith.constant 0 : index
    %c0_27 = arith.constant 0 : index
    %37 = vector.load %arg2[%c0_26, %c0_27] : memref<8x128xf32, #tpu.memory_space<vmem>>, vector<8x128xf32>
    %38 = arith.subf %37, %36 : vector<8x128xf32>
    %39 = arith.mulf %38, %38 : vector<8x128xf32>
    %c0_28 = arith.constant 0 : index
    %c0_29 = arith.constant 0 : index
    %40 = vector.load %arg3[%c0_28, %c0_29] : memref<1x128xf32, #tpu.memory_space<vmem>>, vector<1x128xf32>
    %41 = vector.broadcast %40 : vector<1x128xf32> to vector<8x128xf32>
    %42 = arith.mulf %39, %41 : vector<8x128xf32>
    %cst_30 = arith.constant dense<0.000000e+00> : vector<8xf32>
    %43 = vector.multi_reduction <add>, %42, %cst_30 [1] : vector<8x128xf32> to vector<8xf32>
    %44 = vector.shape_cast %43 : vector<8xf32> to vector<8x1xf32>
    %cst_31 = arith.constant 5.000000e-01 : f32
    %45 = vector.broadcast %cst_31 : f32 to vector<8x1xf32>
    %46 = arith.mulf %45, %44 : vector<8x1xf32>
    %cst_32 = arith.constant -0.9031654 : f32
    %47 = vector.broadcast %cst_32 : f32 to vector<8x1xf32>
    %48 = arith.subf %47, %46 : vector<8x1xf32>
    %49 = tpu.iota {dimensions = array<i32: 1>} : vector<8x128xi32>
    %c5_i32 = arith.constant 5 : i32
    %50 = vector.broadcast %c5_i32 : i32 to vector<8x128xi32>
    %51 = arith.cmpi eq, %49, %50 : vector<8x128xi32>
    %52 = vector.shape_cast %48 : vector<8x1xf32> to vector<8x1xf32>
    %53 = vector.broadcast %52 : vector<8x1xf32> to vector<8x128xf32>
    %54 = arith.select %51, %53, %36 : vector<8x128xi1>, vector<8x128xf32>
    %c0_33 = arith.constant 0 : index
    %c0_34 = arith.constant 0 : index
    %55 = vector.load %arg13[%c0_33, %c0_34] : memref<8x128xf32, #tpu.memory_space<vmem>>, vector<8x128xf32>
    tpu.vector_store %arg13[%c0_33, %c0_34], %54 {strides = array<i32>} : memref<8x128xf32, #tpu.memory_space<vmem>>, vector<8x128xf32>,
    return
  }
  func.func @transform_0(%arg0: i32) -> (i32, i32) {
    %c0_i32 = arith.constant 0 : i32
    %c0_i32_0 = arith.constant 0 : i32
    return %arg0, %c0_i32 : i32, i32
  }
  func.func @transform_1(%arg0: i32) -> (i32, i32) {
    %c0_i32 = arith.constant 0 : i32
    %c0_i32_0 = arith.constant 0 : i32
    return %arg0, %c0_i32 : i32, i32
  }
  func.func @transform_2(%arg0: i32) -> (i32, i32) {
    %c0_i32 = arith.constant 0 : i32
    %c0_i32_0 = arith.constant 0 : i32
    %c0_i32_1 = arith.constant 0 : i32
    return %c0_i32, %c0_i32_0 : i32, i32
  }
  func.func @transform_3(%arg0: i32) -> (i32, i32) {
    %c0_i32 = arith.constant 0 : i32
    %c0_i32_0 = arith.constant 0 : i32
    %c0_i32_1 = arith.constant 0 : i32
    return %c0_i32, %c0_i32_0 : i32, i32
  }
  func.func @transform_4(%arg0: i32) -> (i32, i32) {
    %c0_i32 = arith.constant 0 : i32
    %c0_i32_0 = arith.constant 0 : i32
    %c0_i32_1 = arith.constant 0 : i32
    return %c0_i32, %c0_i32_0 : i32, i32
  }
  func.func @transform_5(%arg0: i32) -> (i32, i32) {
    %c0_i32 = arith.constant 0 : i32
    %c0_i32_0 = arith.constant 0 : i32
    %c0_i32_1 = arith.constant 0 : i32
    return %c0_i32, %c0_i32_0 : i32, i32
  }
  func.func @transform_6(%arg0: i32) -> (i32, i32) {
    %c0_i32 = arith.constant 0 : i32
    %c0_i32_0 = arith.constant 0 : i32
    %c0_i32_1 = arith.constant 0 : i32
    return %c0_i32, %c0_i32_0 : i32, i32
  }
  func.func @transform_7(%arg0: i32) -> (i32, i32) {
    %c0_i32 = arith.constant 0 : i32
    %c0_i32_0 = arith.constant 0 : i32
    %c0_i32_1 = arith.constant 0 : i32
    return %c0_i32, %c0_i32_0 : i32, i32
  }
  func.func @transform_8(%arg0: i32) -> (i32, i32) {
    %c0_i32 = arith.constant 0 : i32
    %c0_i32_0 = arith.constant 0 : i32
    %c0_i32_1 = arith.constant 0 : i32
    return %c0_i32, %c0_i32_0 : i32, i32
  }
  func.func @transform_9(%arg0: i32) -> (i32, i32) {
    %c0_i32 = arith.constant 0 : i32
    %c0_i32_0 = arith.constant 0 : i32
    %c0_i32_1 = arith.constant 0 : i32
    return %c0_i32, %c0_i32_0 : i32, i32
  }
  func.func @transform_10(%arg0: i32) -> (i32, i32) {
    %c0_i32 = arith.constant 0 : i32
    %c0_i32_0 = arith.constant 0 : i32
    %c0_i32_1 = arith.constant 0 : i32
    return %c0_i32, %c0_i32_0 : i32, i32
  }
  func.func @transform_11(%arg0: i32) -> (i32, i32) {
    %c0_i32 = arith.constant 0 : i32
    %c0_i32_0 = arith.constant 0 : i32
    %c0_i32_1 = arith.constant 0 : i32
    return %c0_i32, %c0_i32_0 : i32, i32
  }
  func.func @transform_12(%arg0: i32) -> (i32, i32) {
    %c0_i32 = arith.constant 0 : i32
    %c0_i32_0 = arith.constant 0 : i32
    return %arg0, %c0_i32 : i32, i32
  }
}

</mosaic_0001>

<bundles_post_ra>
// kernel: _eval_impl.1
= control target key start
LH: loop header
LB: loop body
LE: loop exit
PB: predicated region body
PF: predicated region fallthrough
CT: control target
= control target key end

     0   :  { %v3933_v6 = vmov 0   ;;  %vm183_vm0 = vcmask 261120   ;;  %s5114_s0 = inlined_call_operand.vmem [shape: f32[8,32], index: 0, kind: input, shape index: {}]   ;;  %s5115_s1 = inlined_call_operand.vmem [shape: f32[8,128], index: 1, kind: input, shape index: {}]   ;;  %s5116_s2 = inlined_call_operand.vmem [shape: f32[1,128], index: 2, kind: input, shape index: {}]   ;;  %s5117_s3 = inlined_call_operand.vmem [shape: bf16[32,1024], index: 3, kind: input, shape index: {}]   ;;  %s5118_s4 = inlined_call_operand.vmem [shape: f32[1,1024], index: 4, kind: input, shape index: {}]   ;;  %s5119_s5 = inlined_call_operand.vmem [shape: bf16[512,512], index: 5, kind: input, shape index: {}]   ;;  %s5120_s6 = inlined_call_operand.vmem [shape: f32[1,512], index: 6, kind: input, shape index: {}]   ;;  %s5121_s7 = inlined_call_operand.vmem [shape: bf16[512,512], index: 7, kind: input, shape index: {}]   ;;  %s5122_s8 = inlined_call_operand.vmem [shape: f32[1,512], index: 8, kind: input, shape index: {}]   ;;  %s5123_s9 = inlined_call_operand.vmem [shape: bf16[512,128], index: 9, kind: input, shape index: {}]   ;;  %s5124_s10 = inlined_call_operand.vmem [shape: bf16[512,128], index: 10, kind: input, shape index: {}]   ;;  %s5125_s11 = inlined_call_operand.vmem [shape: f32[1,128], index: 11, kind: input, shape index: {}]   ;;  %s5126_s12 = inlined_call_operand.hbm [shape: f32[8,128], index: 12, kind: output, shape index: {}]  }
   0x1   :  { %v45_v0 = vld [vmem:[%s5117_s3] sm:$0xff]  ;;  %219 = vmatprep.mubr.bf16.mxu0 %v3933_v6  ;;  %v46_v7 = vld [vmem:[%s5117_s3 + $0x8] sm:$0xff]  ;;  %260 = vmatprep.mubr.bf16.mxu1 %v3933_v6  ;;  %v47_v15 = vld [vmem:[%s5117_s3 + $0x10] sm:$0xff] }
   0x2   :  { %v49_v1 = vld [vmem:[%s5117_s3 + $0x20] sm:$0xff]  ;;  %v50_v9 = vld [vmem:[%s5117_s3 + $0x28] sm:$0xff]  ;;  %v51_v16 = vld [vmem:[%s5117_s3 + $0x30] sm:$0xff] }
   0x3   :  { %v53_v2 = vld [vmem:[%s5117_s3 + $0x40] sm:$0xff]  ;;  %v3006_v3 = vcombine.high %v45_v0, %v49_v1  ;;  %v3005_v4 = vcombine.low %v45_v0, %v49_v1  ;;  %v54_v10 = vld [vmem:[%s5117_s3 + $0x48] sm:$0xff]  ;;  %v3008_v12 = vcombine.high %v46_v7, %v50_v9  ;;  %v3007_v13 = vcombine.low %v46_v7, %v50_v9  ;;  %v48_v19 = vld [vmem:[%s5117_s3 + $0x18] sm:$0xff] }
   0x4   :  { %v57_v5 = vld [vmem:[%s5117_s3 + $0x60] sm:$0xff]  ;;  %v58_v11 = vld [vmem:[%s5117_s3 + $0x68] sm:$0xff]  ;;  %v52_v20 = vld [vmem:[%s5117_s3 + $0x38] sm:$0xff]  ;;  %v3010_v21 = vcombine.high %v47_v15, %v51_v16  ;;  %v3009_v28 = vcombine.low %v47_v15, %v51_v16 }
   0x5   :  { %v3014_v8 = vcombine.high %v53_v2, %v57_v5  ;;  %187 = vmatprep.subr.bf16.mxu0 %v3006_v3  ;;  %v3016_v14 = vcombine.high %v54_v10, %v58_v11  ;;  %v3013_v17 = vcombine.low %v53_v2, %v57_v5  ;;  %v43_v18 = vld [vmem:[%s5114_s0] sm:$0xff]  ;;  %228 = vmatprep.subr.bf16.mxu1 %v3008_v12  ;;  %v55_v23 = vld [vmem:[%s5117_s3 + $0x50] sm:$0xff]  ;;  %v56_v27 = vld [vmem:[%s5117_s3 + $0x58] sm:$0xff] }
   0x6   :  { %188 = vmatpush1.bf16.msra.mxu0 %v3005_v4  ;;  %229 = vmatpush1.bf16.msra.mxu1 %v3007_v13  ;;  %v3015_v22 = vcombine.low %v54_v10, %v58_v11  ;;  %v59_v24 = vld [vmem:[%s5117_s3 + $0x70] sm:$0xff]  ;;  %v44_v25 = vpack.c.bf16 %v43_v18, %v43_v18  ;;  %v3012_v26 = vcombine.high %v48_v19, %v52_v20  ;;  %v60_v29 = vld [vmem:[%s5117_s3 + $0x78] sm:$0xff] }
   0x7   :  { %189 = vmatprep.subr.bf16.mxu0 %v3014_v8  ;;  %230 = vmatprep.subr.bf16.mxu1 %v3016_v14  ;;  %v3018_v30 = vcombine.high %v55_v23, %v59_v24  ;;  %v3011_v31 = vcombine.low %v48_v19, %v52_v20  ;;  %v3020_v32 = vcombine.high %v56_v27, %v60_v29  ;;  %v3463_v34 = vld [vmem:[%s5119_s5 + $0x4] ss:$16 sps:$4 sm:$0xff]   ;;  %v3466_v36 = vld [vmem:[%s5119_s5 + $0xc] ss:$16 sps:$4 sm:$0xff]   ;;  %v3461_v37 = vld [vmem:[%s5119_s5] ss:$16 sps:$4 sm:$0xff]  }
   0x8   :  { %v3017_v33 = vcombine.low %v55_v23, %v59_v24  ;;  %v3019_v35 = vcombine.low %v56_v27, %v60_v29  ;;  %v3469_v38 = vld [vmem:[%s5119_s5 + $0x24] ss:$16 sps:$4 sm:$0xff]   ;;  %v3464_v39 = vld [vmem:[%s5119_s5 + $0x8] ss:$16 sps:$4 sm:$0xff]   ;;  %v3472_v40 = vld [vmem:[%s5119_s5 + $0x2c] ss:$16 sps:$4 sm:$0xff]  }
   0x9   :  { %v3467_v41 = vld [vmem:[%s5119_s5 + $0x20] ss:$16 sps:$4 sm:$0xff]   ;;  %v3475_v42 = vld [vmem:[%s5119_s5 + $0x44] ss:$16 sps:$4 sm:$0xff]   ;;  %v3470_v43 = vld [vmem:[%s5119_s5 + $0x28] ss:$16 sps:$4 sm:$0xff]  }
   0xa   :  { %190 = vmatpush1.bf16.msra.mxu0 %v3013_v17  ;;  %231 = vmatpush1.bf16.msra.mxu1 %v3015_v22  ;;  %v3478_v44 = vld [vmem:[%s5119_s5 + $0x4c] ss:$16 sps:$4 sm:$0xff]   ;;  %v3473_v45 = vld [vmem:[%s5119_s5 + $0x40] ss:$16 sps:$4 sm:$0xff]   ;;  %v3481_v46 = vld [vmem:[%s5119_s5 + $0x64] ss:$16 sps:$4 sm:$0xff]  }
   0xb   :  { %269 = vmatprep.subr.bf16.mxu0 %v3010_v21  ;;  %310 = vmatprep.subr.bf16.mxu1 %v3012_v26  ;;  %v3476_v47 = vld [vmem:[%s5119_s5 + $0x48] ss:$16 sps:$4 sm:$0xff]   ;;  %v3484_v48 = vld [vmem:[%s5119_s5 + $0x6c] ss:$16 sps:$4 sm:$0xff]   ;;  %v3479_v49 = vld [vmem:[%s5119_s5 + $0x60] ss:$16 sps:$4 sm:$0xff]  }
   0xc   :  { %v3487_v50 = vld [vmem:[%s5119_s5 + $0x84] ss:$16 sps:$4 sm:$0xff]   ;;  %v3482_v51 = vld [vmem:[%s5119_s5 + $0x68] ss:$16 sps:$4 sm:$0xff]   ;;  %v3490_v52 = vld [vmem:[%s5119_s5 + $0x8c] ss:$16 sps:$4 sm:$0xff]  }
   0xd   :  { %3021 = vmatmul.mubr.msk.bf16.vlgmr.msra.gmra.mrb[0].mxu0 %vm183_vm0, %v44_v25  ;;  %3022 = vmatmul.mubr.msk.bf16.vlgmr.msra.gmra.mrb[0].mxu1 %vm183_vm0, %v44_v25  ;;  %v3485_v53 = vld [vmem:[%s5119_s5 + $0x80] ss:$16 sps:$4 sm:$0xff]   ;;  %v3493_v54 = vld [vmem:[%s5119_s5 + $0xa4] ss:$16 sps:$4 sm:$0xff]   ;;  %v3488_v55 = vld [vmem:[%s5119_s5 + $0x88] ss:$16 sps:$4 sm:$0xff]  }
   0xe   :  { %270 = vmatpush1.bf16.msra.mxu0 %v3009_v28  ;;  %301 = vmatprep.mubr.bf16.mxu0 %v3933_v6  ;;  %v3496_v56 = vld [vmem:[%s5119_s5 + $0xac] ss:$16 sps:$4 sm:$0xff]   ;;  %v3491_v57 = vld [vmem:[%s5119_s5 + $0xa0] ss:$16 sps:$4 sm:$0xff]   ;;  %v3499_v58 = vld [vmem:[%s5119_s5 + $0xc4] ss:$16 sps:$4 sm:$0xff]  }
   0xf   :  { %271 = vmatprep.subr.bf16.mxu0 %v3018_v30  ;;  %311 = vmatpush1.bf16.msra.mxu1 %v3011_v31  ;;  %v3494_v59 = vld [vmem:[%s5119_s5 + $0xa8] ss:$16 sps:$4 sm:$0xff]   ;;  %v3502_v60 = vld [vmem:[%s5119_s5 + $0xcc] ss:$16 sps:$4 sm:$0xff]   ;;  %v3497_v61 = vld [vmem:[%s5119_s5 + $0xc0] ss:$16 sps:$4 sm:$0xff]  }
  0x10   :  { %342 = vmatprep.mubr.bf16.mxu1 %v3933_v6  ;;  %312 = vmatprep.subr.bf16.mxu1 %v3020_v32  ;;  %v3500_v62 = vld [vmem:[%s5119_s5 + $0xc8] ss:$16 sps:$4 sm:$0xff]   ;;  %v3505_v63 = vld [vmem:[%s5119_s5 + $0xe4] ss:$16 sps:$4 sm:$0xff]   ;;  %v3503_v0 = vld [vmem:[%s5119_s5 + $0xe0] ss:$16 sps:$4 sm:$0xff]  }
  0x11   :  { %v3508_v1 = vld [vmem:[%s5119_s5 + $0xec] ss:$16 sps:$4 sm:$0xff]   ;;  %v3511_v2 = vld [vmem:[%s5119_s5 + $0x104] ss:$16 sps:$4 sm:$0xff]   ;;  %v3506_v3 = vld [vmem:[%s5119_s5 + $0xe8] ss:$16 sps:$4 sm:$0xff]  }
  0x12   :  { %272 = vmatpush1.bf16.msra.mxu0 %v3017_v33  ;;  %v3514_v4 = vld [vmem:[%s5119_s5 + $0x10c] ss:$16 sps:$4 sm:$0xff]   ;;  %v3509_v5 = vld [vmem:[%s5119_s5 + $0x100] ss:$16 sps:$4 sm:$0xff]   ;;  %v3517_v6 = vld [vmem:[%s5119_s5 + $0x124] ss:$16 sps:$4 sm:$0xff]  }
  0x13   :  { %1157 = vmatprep.subr.bf16.mxu0 %v3463_v34  ;;  %313 = vmatpush1.bf16.msra.mxu1 %v3019_v35  ;;  %v3512_v7 = vld [vmem:[%s5119_s5 + $0x108] ss:$16 sps:$4 sm:$0xff]   ;;  %v3520_v8 = vld [vmem:[%s5119_s5 + $0x12c] ss:$16 sps:$4 sm:$0xff]   ;;  %v3515_v9 = vld [vmem:[%s5119_s5 + $0x120] ss:$16 sps:$4 sm:$0xff]  }
  0x14   :  { %1239 = vmatprep.subr.bf16.mxu1 %v3466_v36  ;;  %v3523_v10 = vld [vmem:[%s5119_s5 + $0x144] ss:$16 sps:$4 sm:$0xff]   ;;  %v3518_v11 = vld [vmem:[%s5119_s5 + $0x128] ss:$16 sps:$4 sm:$0xff]   ;;  %v3526_v12 = vld [vmem:[%s5119_s5 + $0x14c] ss:$16 sps:$4 sm:$0xff]  }
  0x15   :  { %3023 = vmatmul.mubr.msk.bf16.vlgmr.msra.gmra.mrb[4].mxu0 %vm183_vm0, %v44_v25  ;;  %v3521_v13 = vld [vmem:[%s5119_s5 + $0x140] ss:$16 sps:$4 sm:$0xff]   ;;  %v3529_v14 = vld [vmem:[%s5119_s5 + $0x164] ss:$16 sps:$4 sm:$0xff]   ;;  %v3524_v15 = vld [vmem:[%s5119_s5 + $0x148] ss:$16 sps:$4 sm:$0xff]  }
  0x16   :  { %1158 = vmatpush1.bf16.msra.mxu0 %v3461_v37  ;;  %3024 = vmatmul.mubr.msk.bf16.vlgmr.msra.gmra.mrb[4].mxu1 %vm183_vm0, %v44_v25  ;;  %v3532_v16 = vld [vmem:[%s5119_s5 + $0x16c] ss:$16 sps:$4 sm:$0xff]   ;;  %v3527_v17 = vld [vmem:[%s5119_s5 + $0x160] ss:$16 sps:$4 sm:$0xff]   ;;  %v3535_v18 = vld [vmem:[%s5119_s5 + $0x184] ss:$16 sps:$4 sm:$0xff]  }
  0x17   :  { %1159 = vmatprep.subr.bf16.mxu0 %v3469_v38  ;;  %1240 = vmatpush1.bf16.msra.mxu1 %v3464_v39  ;;  %v3530_v19 = vld [vmem:[%s5119_s5 + $0x168] ss:$16 sps:$4 sm:$0xff]   ;;  %v3538_v20 = vld [vmem:[%s5119_s5 + $0x18c] ss:$16 sps:$4 sm:$0xff]   ;;  %v3533_v21 = vld [vmem:[%s5119_s5 + $0x180] ss:$16 sps:$4 sm:$0xff]  }
  0x18   :  { %1241 = vmatprep.subr.bf16.mxu1 %v3472_v40  ;;  %v3541_v22 = vld [vmem:[%s5119_s5 + $0x1a4] ss:$16 sps:$4 sm:$0xff]   ;;  %v3536_v23 = vld [vmem:[%s5119_s5 + $0x188] ss:$16 sps:$4 sm:$0xff]   ;;  %v3544_v24 = vld [vmem:[%s5119_s5 + $0x1ac] ss:$16 sps:$4 sm:$0xff]  }
  0x19   :  { %v3539_v25 = vld [vmem:[%s5119_s5 + $0x1a0] ss:$16 sps:$4 sm:$0xff]   ;;  %v3542_v26 = vld [vmem:[%s5119_s5 + $0x1a8] ss:$16 sps:$4 sm:$0xff]   ;;  %v3547_v27 = vld [vmem:[%s5119_s5 + $0x1c4] ss:$16 sps:$4 sm:$0xff]  }
  0x1a   :  { %1160 = vmatpush1.bf16.msra.mxu0 %v3467_v41  ;;  %v3550_v28 = vld [vmem:[%s5119_s5 + $0x1cc] ss:$16 sps:$4 sm:$0xff]   ;;  %v3545_v29 = vld [vmem:[%s5119_s5 + $0x1c0] ss:$16 sps:$4 sm:$0xff]   ;;  %v3548_v30 = vld [vmem:[%s5119_s5 + $0x1c8] ss:$16 sps:$4 sm:$0xff]  }
  0x1b   :  { %1161 = vmatprep.subr.bf16.mxu0 %v3475_v42  ;;  %1242 = vmatpush1.bf16.msra.mxu1 %v3470_v43  ;;  %v3553_v31 = vld [vmem:[%s5119_s5 + $0x1e4] ss:$16 sps:$4 sm:$0xff]   ;;  %v3556_v32 = vld [vmem:[%s5119_s5 + $0x1ec] ss:$16 sps:$4 sm:$0xff]   ;;  %v3551_v33 = vld [vmem:[%s5119_s5 + $0x1e0] ss:$16 sps:$4 sm:$0xff]  }
  0x1c   :  { %1243 = vmatprep.subr.bf16.mxu1 %v3478_v44  ;;  %v3554_v34 = vld [vmem:[%s5119_s5 + $0x1e8] ss:$16 sps:$4 sm:$0xff]   ;;  %v3559_v35 = vld [vmem:[%s5119_s5 + $0x204] ss:$16 sps:$4 sm:$0xff]   ;;  %v3562_v36 = vld [vmem:[%s5119_s5 + $0x20c] ss:$16 sps:$4 sm:$0xff]  }
  0x1e   :  { %1162 = vmatpush1.bf16.msra.mxu0 %v3473_v45 }
  0x1f   :  { %1163 = vmatprep.subr.bf16.mxu0 %v3481_v46  ;;  %1244 = vmatpush1.bf16.msra.mxu1 %v3476_v47 }
  0x20   :  { %1245 = vmatprep.subr.bf16.mxu1 %v3484_v48 }
  0x22   :  { %1164 = vmatpush1.bf16.msra.mxu0 %v3479_v49 }
  0x23   :  { %1165 = vmatprep.subr.bf16.mxu0 %v3487_v50  ;;  %1246 = vmatpush1.bf16.msra.mxu1 %v3482_v51 }
  0x24   :  { %1247 = vmatprep.subr.bf16.mxu1 %v3490_v52 }
  0x26   :  { %1166 = vmatpush1.bf16.msra.mxu0 %v3485_v53 }
  0x27   :  { %1167 = vmatprep.subr.bf16.mxu0 %v3493_v54  ;;  %1248 = vmatpush1.bf16.msra.mxu1 %v3488_v55 }
  0x28   :  { %1249 = vmatprep.subr.bf16.mxu1 %v3496_v56 }
  0x2a   :  { %1168 = vmatpush1.bf16.msra.mxu0 %v3491_v57 }
  0x2b   :  { %1169 = vmatprep.subr.bf16.mxu0 %v3499_v58  ;;  %1250 = vmatpush1.bf16.msra.mxu1 %v3494_v59 }
  0x2c   :  { %1251 = vmatprep.subr.bf16.mxu1 %v3502_v60 }
  0x2e   :  { %1170 = vmatpush1.bf16.msra.mxu0 %v3497_v61 }
  0x2f   :  { %1171 = vmatprep.subr.bf16.mxu0 %v3505_v63  ;;  %1252 = vmatpush1.bf16.msra.mxu1 %v3500_v62 }
  0x30   :  { %1253 = vmatprep.subr.bf16.mxu1 %v3508_v1 }
  0x32   :  { %1172 = vmatpush1.bf16.msra.mxu0 %v3503_v0 }
  0x33   :  { %1173 = vmatprep.subr.bf16.mxu0 %v3511_v2  ;;  %1254 = vmatpush1.bf16.msra.mxu1 %v3506_v3 }
  0x34   :  { %1255 = vmatprep.subr.bf16.mxu1 %v3514_v4 }
  0x36   :  { %1174 = vmatpush1.bf16.msra.mxu0 %v3509_v5 }
  0x37   :  { %1175 = vmatprep.subr.bf16.mxu0 %v3517_v6  ;;  %1256 = vmatpush1.bf16.msra.mxu1 %v3512_v7 }
  0x38   :  { %1257 = vmatprep.subr.bf16.mxu1 %v3520_v8 }
  0x3a   :  { %1176 = vmatpush1.bf16.msra.mxu0 %v3515_v9 }
  0x3b   :  { %1177 = vmatprep.subr.bf16.mxu0 %v3523_v10  ;;  %1258 = vmatpush1.bf16.msra.mxu1 %v3518_v11 }
  0x3c   :  { %1259 = vmatprep.subr.bf16.mxu1 %v3526_v12 }
  0x3e   :  { %1178 = vmatpush1.bf16.msra.mxu0 %v3521_v13 }
  0x3f   :  { %1179 = vmatprep.subr.bf16.mxu0 %v3529_v14  ;;  %1260 = vmatpush1.bf16.msra.mxu1 %v3524_v15 }
  0x40   :  { %1261 = vmatprep.subr.bf16.mxu1 %v3532_v16 }
  0x42   :  { %1180 = vmatpush1.bf16.msra.mxu0 %v3527_v17 }
  0x43   :  { %1181 = vmatprep.subr.bf16.mxu0 %v3535_v18  ;;  %1262 = vmatpush1.bf16.msra.mxu1 %v3530_v19 }
  0x44   :  { %1263 = vmatprep.subr.bf16.mxu1 %v3538_v20 }
  0x46   :  { %1182 = vmatpush1.bf16.msra.mxu0 %v3533_v21 }
  0x47   :  { %1183 = vmatprep.subr.bf16.mxu0 %v3541_v22  ;;  %1264 = vmatpush1.bf16.msra.mxu1 %v3536_v23 }
  0x48   :  { %1265 = vmatprep.subr.bf16.mxu1 %v3544_v24 }
  0x4a   :  { %1184 = vmatpush1.bf16.msra.mxu0 %v3539_v25 }
  0x4b   :  { %1266 = vmatpush1.bf16.msra.mxu1 %v3542_v26  ;;  %1185 = vmatprep.subr.bf16.mxu0 %v3547_v27 }
  0x4c   :  { %1267 = vmatprep.subr.bf16.mxu1 %v3550_v28 }
  0x4e   :  { %1186 = vmatpush1.bf16.msra.mxu0 %v3545_v29 }
  0x4f   :  { %1268 = vmatpush1.bf16.msra.mxu1 %v3548_v30  ;;  %1187 = vmatprep.subr.bf16.mxu0 %v3553_v31 }
  0x50   :  { %1269 = vmatprep.subr.bf16.mxu1 %v3556_v32 }
  0x52   :  { %1188 = vmatpush1.bf16.msra.mxu0 %v3551_v33 }
  0x53   :  { %1270 = vmatpush1.bf16.msra.mxu1 %v3554_v34  ;;  %1198 = vmatprep.subr.bf16.mxu0 %v3559_v35 }
  0x54   :  { %1280 = vmatprep.subr.bf16.mxu1 %v3562_v36 }
  0x55   :  { %17 = vsyncpa [#allocation3], 0  ;;  %v63_v37 = vlaneseq  ;;  %v4262_v40 = vld [vmem:[%s5118_s4] sm:$0xff]  ;;  %v3560_v61 = vld [vmem:[%s5119_s5 + $0x208] ss:$16 sps:$4 sm:$0xff]   ;;  %s3934_s14 = smov [#allocation2]  }
  0x56   :  { %v3557_v60 = vld [vmem:[%s5119_s5 + $0x200] ss:$16 sps:$4 sm:$0xff]   ;;  %v3565_v0 = vld [vmem:[%s5119_s5 + $0x224] ss:$16 sps:$4 sm:$0xff]   ;;  %v3568_v1 = vld [vmem:[%s5119_s5 + $0x22c] ss:$16 sps:$4 sm:$0xff]  }
  0x57   :  { %v4254_v38 = vshrl.u32 %v63_v37, 7  ;;  %v3563_v5 = vld [vmem:[%s5119_s5 + $0x220] ss:$16 sps:$4 sm:$0xff]   ;;  %v3566_v6 = vld [vmem:[%s5119_s5 + $0x228] ss:$16 sps:$4 sm:$0xff]  }
  0x58   :  { %v3571_v8 = vld [vmem:[%s5119_s5 + $0x244] ss:$16 sps:$4 sm:$0xff]   ;;  %v3574_v9 = vld [vmem:[%s5119_s5 + $0x24c] ss:$16 sps:$4 sm:$0xff]   ;;  %v3569_v11 = vld [vmem:[%s5119_s5 + $0x240] ss:$16 sps:$4 sm:$0xff]  }
  0x59   :  { %v4257_v39 = vsub.s32 0, %v4254_v38  ;;  %v4265_v41 = vsub.s32 1, %v4254_v38  ;;  %v4268_v42 = vsub.s32 3, %v4254_v38  ;;  %v3572_v12 = vld [vmem:[%s5119_s5 + $0x248] ss:$16 sps:$4 sm:$0xff]  }
  0x5a   :  { %v3577_v13 = vld [vmem:[%s5119_s5 + $0x264] ss:$16 sps:$4 sm:$0xff]   ;;  %v3580_v14 = vld [vmem:[%s5119_s5 + $0x26c] ss:$16 sps:$4 sm:$0xff]   ;;  %v3575_v15 = vld [vmem:[%s5119_s5 + $0x260] ss:$16 sps:$4 sm:$0xff]  }
  0x5b   :  { %v66_v43 = vrot.slane %v4262_v40, %v4257_v39  ;;  %v70_v44 = vrot.slane %v4262_v40, %v4265_v41  ;;  %v78_v46 = vrot.slane %v4262_v40, %v4268_v42  ;;  %v3578_v16 = vld [vmem:[%s5119_s5 + $0x268] ss:$16 sps:$4 sm:$0xff]   ;;  %v3583_v17 = vld [vmem:[%s5119_s5 + $0x284] ss:$16 sps:$4 sm:$0xff]   ;;  %v3586_v18 = vld [vmem:[%s5119_s5 + $0x28c] ss:$16 sps:$4 sm:$0xff]  }
  0x5c   :  { %v3581_v19 = vld [vmem:[%s5119_s5 + $0x280] ss:$16 sps:$4 sm:$0xff]   ;;  %v3584_v20 = vld [vmem:[%s5119_s5 + $0x288] ss:$16 sps:$4 sm:$0xff]   ;;  %v3589_v21 = vld [vmem:[%s5119_s5 + $0x2a4] ss:$16 sps:$4 sm:$0xff]  }
  0x5d   :  { %v3592_v22 = vld [vmem:[%s5119_s5 + $0x2ac] ss:$16 sps:$4 sm:$0xff]   ;;  %v3587_v23 = vld [vmem:[%s5119_s5 + $0x2a0] ss:$16 sps:$4 sm:$0xff]   ;;  %v3590_v24 = vld [vmem:[%s5119_s5 + $0x2a8] ss:$16 sps:$4 sm:$0xff]  }
  0x5e   :  { %v3595_v26 = vld [vmem:[%s5119_s5 + $0x2c4] ss:$16 sps:$4 sm:$0xff]   ;;  %v3598_v27 = vld [vmem:[%s5119_s5 + $0x2cc] ss:$16 sps:$4 sm:$0xff]   ;;  %v3593_v31 = vld [vmem:[%s5119_s5 + $0x2c0] ss:$16 sps:$4 sm:$0xff]  }
  0x5f   :  { %v3596_v32 = vld [vmem:[%s5119_s5 + $0x2c8] ss:$16 sps:$4 sm:$0xff]   ;;  %v3601_v33 = vld [vmem:[%s5119_s5 + $0x2e4] ss:$16 sps:$4 sm:$0xff]   ;;  %v3604_v34 = vld [vmem:[%s5119_s5 + $0x2ec] ss:$16 sps:$4 sm:$0xff]  }
  0x60   :  { %v3599_v35 = vld [vmem:[%s5119_s5 + $0x2e0] ss:$16 sps:$4 sm:$0xff]   ;;  %v3602_v36 = vld [vmem:[%s5119_s5 + $0x2e8] ss:$16 sps:$4 sm:$0xff]  }
  0xe0   :  { %v221_v45 = vpop.f32.mrb[0].mxu0  ;;  %v4276_v51 = vpop.f32.mrb[0].mxu1 }
  0xe1   :  { %v222_v47 = vadd.f32 %v221_v45, %v66_v43  ;;  %v223_v48 = vpop.f32.mrb[1].mxu0  ;;  %v264_v54 = vpop.f32.mrb[1].mxu1  ;;  %v3607_v43 = vld [vmem:[%s5119_s5 + $0x304] ss:$16 sps:$4 sm:$0xff]   ;;  %v3605_v45 = vld [vmem:[%s5119_s5 + $0x300] ss:$16 sps:$4 sm:$0xff]  }
  0xe2   :  { %v224_v49 = vadd.f32 %v223_v48, %v70_v44  ;;  %v225_v50 = vpop.f32.mrb[2].mxu0  ;;  %v265_v56 = vadd.f32 %v264_v54, %v78_v46  ;;  %v266_v57 = vpop.f32.mrb[2].mxu1  ;;  %v3610_v44 = vld [vmem:[%s5119_s5 + $0x30c] ss:$16 sps:$4 sm:$0xff]   ;;  %v3608_v46 = vld [vmem:[%s5119_s5 + $0x308] ss:$16 sps:$4 sm:$0xff]  }
  0xe3   :  { %v351_v52 = vmax.f32 %v222_v47, 0.0  ;;  %v226_v53 = vpop.f32.mrb[3].mxu0  ;;  %v267_v58 = vpop.f32.mrb[3].mxu1  ;;  %v3613_v47 = vld [vmem:[%s5119_s5 + $0x324] ss:$16 sps:$4 sm:$0xff]  }
  0xe4   :  { %v352_v55 = vmax.f32 %v224_v49, 0.0  ;;  %v354_v62 = vmax.f32 %v265_v56, 0.0  ;;  %v3616_v48 = vld [vmem:[%s5119_s5 + $0x32c] ss:$16 sps:$4 sm:$0xff]   ;;  %v3611_v49 = vld [vmem:[%s5119_s5 + $0x320] ss:$16 sps:$4 sm:$0xff]  }
  0xe5   :  { %v359_v63 = vpack.c.bf16 %v351_v52, %v351_v52  ;;  %v3614_v50 = vld [vmem:[%s5119_s5 + $0x328] ss:$16 sps:$4 sm:$0xff]   ;;  %v3619_v52 = vld [vmem:[%s5119_s5 + $0x344] ss:$16 sps:$4 sm:$0xff]   ;;  %v3622_v53 = vld [vmem:[%s5119_s5 + $0x34c] ss:$16 sps:$4 sm:$0xff]  }
  0xe6   :  { %v360_v59 = vpack.c.bf16 %v352_v55, %v352_v55  ;;  %v362_v2 = vpack.c.bf16 %v354_v62, %v354_v62  ;;  %v3617_v54 = vld [vmem:[%s5119_s5 + $0x340] ss:$16 sps:$4 sm:$0xff]   ;;  %v3620_v55 = vld [vmem:[%s5119_s5 + $0x348] ss:$16 sps:$4 sm:$0xff]   ;;  %v3625_v56 = vld [vmem:[%s5119_s5 + $0x364] ss:$16 sps:$4 sm:$0xff]  }
  0xe7   :  { %v3628_v57 = vld [vmem:[%s5119_s5 + $0x36c] ss:$16 sps:$4 sm:$0xff]   ;;  %v3623_v58 = vld [vmem:[%s5119_s5 + $0x360] ss:$16 sps:$4 sm:$0xff]   ;;  %v4431_v62 = vsub.s32 2, %v4254_v38 }
  0xe8   :  { %1189 = vmatprep.mubr.bf16.mxu0 %v360_v59  ;;  %1271 = vmatprep.mubr.bf16.mxu1 %v360_v59  ;;  %v4290_v3 = vpop.f32.mrb[4].mxu0  ;;  %v3626_v59 = vld [vmem:[%s5119_s5 + $0x368] ss:$16 sps:$4 sm:$0xff]  }
  0xe9   :  { %1190 = vmatmul.mubr.bf16.vlgmr.msra.gmra.mrb[8].mxu0 %v359_v63  ;;  %1272 = vmatmul.mubr.bf16.vlgmr.msra.gmra.mrb[8].mxu1 %v359_v63  ;;  %v4292_v4 = vpop.f32.mrb[5].mxu0  ;;  %v4348_v25 = vpop.f32.mrb[4].mxu1  ;;  %v3629_v63 = vld [vmem:[%s5119_s5 + $0x380] ss:$16 sps:$4 sm:$0xff]  }
  0xea   :  { %1199 = vmatpush1.bf16.msra.mxu0 %v3557_v60  ;;  %1281 = vmatpush1.bf16.msra.mxu1 %v3560_v61  ;;  %v307_v7 = vpop.f32.mrb[6].mxu0  ;;  %v4356_v28 = vpop.f32.mrb[5].mxu1  ;;  %v3631_v60 = vld [vmem:[%s5119_s5 + $0x384] ss:$16 sps:$4 sm:$0xff]   ;;  %v3634_v61 = vld [vmem:[%s5119_s5 + $0x38c] ss:$16 sps:$4 sm:$0xff]  }
  0xeb   :  { %1200 = vmatprep.subr.bf16.mxu0 %v3565_v0  ;;  %1282 = vmatprep.subr.bf16.mxu1 %v3568_v1  ;;  %v308_v10 = vpop.f32.mrb[7].mxu0  ;;  %v348_v29 = vpop.f32.mrb[6].mxu1  ;;  %v3632_v0 = vld [vmem:[%s5119_s5 + $0x388] ss:$16 sps:$4 sm:$0xff]   ;;  %v3637_v1 = vld [vmem:[%s5119_s5 + $0x3a4] ss:$16 sps:$4 sm:$0xff]  }
  0xec   :  { %1230 = vmatprep.mubr.bf16.mxu0 %v362_v2  ;;  %1312 = vmatprep.mubr.bf16.mxu1 %v362_v2  ;;  %v349_v30 = vpop.f32.mrb[7].mxu1  ;;  %v3640_v2 = vld [vmem:[%s5119_s5 + $0x3ac] ss:$16 sps:$4 sm:$0xff]   ;;  %v3635_v7 = vld [vmem:[%s5119_s5 + $0x3a0] ss:$16 sps:$4 sm:$0xff]  }
  0xed   :  { %v3646_v10 = vld [vmem:[%s5119_s5 + $0x3cc] ss:$16 sps:$4 sm:$0xff]   ;;  %v3659_v30 = vld [vmem:[%s5121_s7 + $0x20] ss:$16 sps:$4 sm:$0xff]  }
  0xee   :  { %1201 = vmatpush1.bf16.msra.mxu0 %v3563_v5  ;;  %1283 = vmatpush1.bf16.msra.mxu1 %v3566_v6  ;;  %v85_v5 = vsub.s32 5, %v4254_v38  ;;  %v74_v6 = vrot.slane %v4262_v40, %v4431_v62 }
  0xef   :  { %1202 = vmatprep.subr.bf16.mxu0 %v3571_v8  ;;  %1284 = vmatprep.subr.bf16.mxu1 %v3574_v9  ;;  %v3638_v8 = vld [vmem:[%s5119_s5 + $0x3a8] ss:$16 sps:$4 sm:$0xff]   ;;  %v3643_v9 = vld [vmem:[%s5119_s5 + $0x3c4] ss:$16 sps:$4 sm:$0xff]  }
  0xf2   :  { %1203 = vmatpush1.bf16.msra.mxu0 %v3569_v11  ;;  %1285 = vmatpush1.bf16.msra.mxu1 %v3572_v12  ;;  %v86_v11 = vrot.slane %v4262_v40, %v85_v5  ;;  %v263_v12 = vadd.f32 %v4276_v51, %v74_v6  ;;  %v3652_v51 = vld [vmem:[%s5119_s5 + $0x3ec] ss:$16 sps:$4 sm:$0xff]   ;;  %v3704_v5 = vld [vmem:[%s5121_s7 + $0x108] ss:$16 sps:$4 sm:$0xff]   ;;  %v3709_v6 = vld [vmem:[%s5121_s7 + $0x124] ss:$16 sps:$4 sm:$0xff]  }
  0xf3   :  { %1204 = vmatprep.subr.bf16.mxu0 %v3577_v13  ;;  %1286 = vmatprep.subr.bf16.mxu1 %v3580_v14  ;;  %v3641_v13 = vld [vmem:[%s5119_s5 + $0x3c0] ss:$16 sps:$4 sm:$0xff]   ;;  %v3644_v14 = vld [vmem:[%s5119_s5 + $0x3c8] ss:$16 sps:$4 sm:$0xff]  }
  0xf6   :  { %1205 = vmatpush1.bf16.msra.mxu0 %v3575_v15  ;;  %1287 = vmatpush1.bf16.msra.mxu1 %v3578_v16  ;;  %v3649_v15 = vld [vmem:[%s5119_s5 + $0x3e4] ss:$16 sps:$4 sm:$0xff]   ;;  %v306_v16 = vadd.f32 %v4292_v4, %v86_v11  ;;  %v3658_v4 = vld [vmem:[%s5121_s7 + $0xc] ss:$16 sps:$4 sm:$0xff]  }
  0xf7   :  { %1206 = vmatprep.subr.bf16.mxu0 %v3583_v17  ;;  %1288 = vmatprep.subr.bf16.mxu1 %v3586_v18  ;;  %v353_v17 = vmax.f32 %v263_v12, 0.0  ;;  %v3647_v18 = vld [vmem:[%s5119_s5 + $0x3e0] ss:$16 sps:$4 sm:$0xff]   ;;  %v3718_v11 = vld [vmem:[%s5121_s7 + $0x14c] ss:$16 sps:$4 sm:$0xff]  }
  0xf8   :  { %v3713_v12 = vld [vmem:[%s5121_s7 + $0x140] ss:$16 sps:$4 sm:$0xff]  }
  0xfa   :  { %1207 = vmatpush1.bf16.msra.mxu0 %v3581_v19  ;;  %1289 = vmatpush1.bf16.msra.mxu1 %v3584_v20  ;;  %v3650_v19 = vld [vmem:[%s5119_s5 + $0x3e8] ss:$16 sps:$4 sm:$0xff]   ;;  %v3655_v20 = vld [vmem:[%s5121_s7 + $0x4] ss:$16 sps:$4 sm:$0xff]  }
  0xfb   :  { %1208 = vmatprep.subr.bf16.mxu0 %v3589_v21  ;;  %1290 = vmatprep.subr.bf16.mxu1 %v3592_v22  ;;  %v356_v21 = vmax.f32 %v306_v16, 0.0  ;;  %v361_v22 = vpack.c.bf16 %v353_v17, %v353_v17  ;;  %v3722_v16 = vld [vmem:[%s5121_s7 + $0x168] ss:$16 sps:$4 sm:$0xff]   ;;  %v3727_v17 = vld [vmem:[%s5121_s7 + $0x184] ss:$16 sps:$4 sm:$0xff]  }
  0xfd   :  { %v364_v29 = vpack.c.bf16 %v356_v21, %v356_v21  ;;  %v3733_v21 = vld [vmem:[%s5121_s7 + $0x1a4] ss:$16 sps:$4 sm:$0xff]  }
  0xfe   :  { %1209 = vmatpush1.bf16.msra.mxu0 %v3587_v23  ;;  %1291 = vmatpush1.bf16.msra.mxu1 %v3590_v24  ;;  %v3653_v23 = vld [vmem:[%s5121_s7] ss:$16 sps:$4 sm:$0xff]   ;;  %v3656_v24 = vld [vmem:[%s5121_s7 + $0x8] ss:$16 sps:$4 sm:$0xff]  }
  0xff   :  { %1210 = vmatprep.subr.bf16.mxu0 %v3595_v26  ;;  %1292 = vmatprep.subr.bf16.mxu1 %v3598_v27  ;;  %v3661_v26 = vld [vmem:[%s5121_s7 + $0x24] ss:$16 sps:$4 sm:$0xff]   ;;  %v3664_v27 = vld [vmem:[%s5121_s7 + $0x2c] ss:$16 sps:$4 sm:$0xff]  }
 0x102   :  { %1211 = vmatpush1.bf16.msra.mxu0 %v3593_v31  ;;  %1293 = vmatpush1.bf16.msra.mxu1 %v3596_v32  ;;  %v3662_v31 = vld [vmem:[%s5121_s7 + $0x28] ss:$16 sps:$4 sm:$0xff]   ;;  %v3667_v32 = vld [vmem:[%s5121_s7 + $0x44] ss:$16 sps:$4 sm:$0xff]  }
 0x103   :  { %1212 = vmatprep.subr.bf16.mxu0 %v3601_v33  ;;  %1294 = vmatprep.subr.bf16.mxu1 %v3604_v34  ;;  %v3670_v33 = vld [vmem:[%s5121_s7 + $0x4c] ss:$16 sps:$4 sm:$0xff]   ;;  %v3665_v34 = vld [vmem:[%s5121_s7 + $0x40] ss:$16 sps:$4 sm:$0xff]  }
 0x106   :  { %1213 = vmatpush1.bf16.msra.mxu0 %v3599_v35  ;;  %1295 = vmatpush1.bf16.msra.mxu1 %v3602_v36  ;;  %v3668_v35 = vld [vmem:[%s5121_s7 + $0x48] ss:$16 sps:$4 sm:$0xff]   ;;  %v3673_v36 = vld [vmem:[%s5121_s7 + $0x64] ss:$16 sps:$4 sm:$0xff]  }
 0x107   :  { %1214 = vmatprep.subr.bf16.mxu0 %v3607_v43  ;;  %1296 = vmatprep.subr.bf16.mxu1 %v3610_v44  ;;  %v3676_v43 = vld [vmem:[%s5121_s7 + $0x6c] ss:$16 sps:$4 sm:$0xff]   ;;  %v3671_v44 = vld [vmem:[%s5121_s7 + $0x60] ss:$16 sps:$4 sm:$0xff]  }
 0x10a   :  { %1215 = vmatpush1.bf16.msra.mxu0 %v3605_v45  ;;  %1297 = vmatpush1.bf16.msra.mxu1 %v3608_v46  ;;  %v3674_v45 = vld [vmem:[%s5121_s7 + $0x68] ss:$16 sps:$4 sm:$0xff]   ;;  %v3679_v46 = vld [vmem:[%s5121_s7 + $0x84] ss:$16 sps:$4 sm:$0xff]  }
 0x10b   :  { %1216 = vmatprep.subr.bf16.mxu0 %v3613_v47  ;;  %1298 = vmatprep.subr.bf16.mxu1 %v3616_v48  ;;  %v3682_v47 = vld [vmem:[%s5121_s7 + $0x8c] ss:$16 sps:$4 sm:$0xff]   ;;  %v3677_v48 = vld [vmem:[%s5121_s7 + $0x80] ss:$16 sps:$4 sm:$0xff]  }
 0x10e   :  { %1217 = vmatpush1.bf16.msra.mxu0 %v3611_v49  ;;  %1299 = vmatpush1.bf16.msra.mxu1 %v3614_v50  ;;  %v3680_v49 = vld [vmem:[%s5121_s7 + $0x88] ss:$16 sps:$4 sm:$0xff]   ;;  %v3685_v50 = vld [vmem:[%s5121_s7 + $0xa4] ss:$16 sps:$4 sm:$0xff]  }
 0x10f   :  { %1218 = vmatprep.subr.bf16.mxu0 %v3619_v52  ;;  %1300 = vmatprep.subr.bf16.mxu1 %v3622_v53  ;;  %v3688_v52 = vld [vmem:[%s5121_s7 + $0xac] ss:$16 sps:$4 sm:$0xff]   ;;  %v3683_v53 = vld [vmem:[%s5121_s7 + $0xa0] ss:$16 sps:$4 sm:$0xff]  }
 0x112   :  { %1219 = vmatpush1.bf16.msra.mxu0 %v3617_v54  ;;  %1301 = vmatpush1.bf16.msra.mxu1 %v3620_v55  ;;  %v3686_v54 = vld [vmem:[%s5121_s7 + $0xa8] ss:$16 sps:$4 sm:$0xff]   ;;  %v3691_v55 = vld [vmem:[%s5121_s7 + $0xc4] ss:$16 sps:$4 sm:$0xff]  }
 0x113   :  { %1220 = vmatprep.subr.bf16.mxu0 %v3625_v56  ;;  %1302 = vmatprep.subr.bf16.mxu1 %v3628_v57  ;;  %v3694_v56 = vld [vmem:[%s5121_s7 + $0xcc] ss:$16 sps:$4 sm:$0xff]   ;;  %v3689_v57 = vld [vmem:[%s5121_s7 + $0xc0] ss:$16 sps:$4 sm:$0xff]  }
 0x116   :  { %1221 = vmatpush1.bf16.msra.mxu0 %v3623_v58  ;;  %1303 = vmatpush1.bf16.msra.mxu1 %v3626_v59  ;;  %v3692_v58 = vld [vmem:[%s5121_s7 + $0xc8] ss:$16 sps:$4 sm:$0xff]   ;;  %v3697_v59 = vld [vmem:[%s5121_s7 + $0xe4] ss:$16 sps:$4 sm:$0xff]  }
 0x117   :  { %1222 = vmatprep.subr.bf16.mxu0 %v3631_v60  ;;  %1304 = vmatprep.subr.bf16.mxu1 %v3634_v61  ;;  %v3700_v60 = vld [vmem:[%s5121_s7 + $0xec] ss:$16 sps:$4 sm:$0xff]   ;;  %v3695_v61 = vld [vmem:[%s5121_s7 + $0xe0] ss:$16 sps:$4 sm:$0xff]  }
 0x11a   :  { %1223 = vmatpush1.bf16.msra.mxu0 %v3629_v63  ;;  %1305 = vmatpush1.bf16.msra.mxu1 %v3632_v0  ;;  %v3698_v63 = vld [vmem:[%s5121_s7 + $0xe8] ss:$16 sps:$4 sm:$0xff]   ;;  %v3703_v0 = vld [vmem:[%s5121_s7 + $0x104] ss:$16 sps:$4 sm:$0xff]  }
 0x11b   :  { %1224 = vmatprep.subr.bf16.mxu0 %v3637_v1  ;;  %1306 = vmatprep.subr.bf16.mxu1 %v3640_v2  ;;  %v3706_v1 = vld [vmem:[%s5121_s7 + $0x10c] ss:$16 sps:$4 sm:$0xff]   ;;  %v3701_v2 = vld [vmem:[%s5121_s7 + $0x100] ss:$16 sps:$4 sm:$0xff]  }
 0x11e   :  { %1225 = vmatpush1.bf16.msra.mxu0 %v3635_v7  ;;  %1307 = vmatpush1.bf16.msra.mxu1 %v3638_v8  ;;  %v3712_v7 = vld [vmem:[%s5121_s7 + $0x12c] ss:$16 sps:$4 sm:$0xff]   ;;  %v3707_v8 = vld [vmem:[%s5121_s7 + $0x120] ss:$16 sps:$4 sm:$0xff]  }
 0x11f   :  { %1226 = vmatprep.subr.bf16.mxu0 %v3643_v9  ;;  %1308 = vmatprep.subr.bf16.mxu1 %v3646_v10  ;;  %v3710_v9 = vld [vmem:[%s5121_s7 + $0x128] ss:$16 sps:$4 sm:$0xff]   ;;  %v3715_v10 = vld [vmem:[%s5121_s7 + $0x144] ss:$16 sps:$4 sm:$0xff]  }
 0x122   :  { %1227 = vmatpush1.bf16.msra.mxu0 %v3641_v13  ;;  %1309 = vmatpush1.bf16.msra.mxu1 %v3644_v14  ;;  %v3716_v13 = vld [vmem:[%s5121_s7 + $0x148] ss:$16 sps:$4 sm:$0xff]   ;;  %v3721_v14 = vld [vmem:[%s5121_s7 + $0x164] ss:$16 sps:$4 sm:$0xff]  }
 0x123   :  { %1228 = vmatprep.subr.bf16.mxu0 %v3649_v15  ;;  %1310 = vmatprep.subr.bf16.mxu1 %v3652_v51  ;;  %v3724_v15 = vld [vmem:[%s5121_s7 + $0x16c] ss:$16 sps:$4 sm:$0xff]   ;;  %v3719_v51 = vld [vmem:[%s5121_s7 + $0x160] ss:$16 sps:$4 sm:$0xff]  }
 0x126   :  { %1229 = vmatpush1.bf16.msra.mxu0 %v3647_v18  ;;  %1311 = vmatpush1.bf16.msra.mxu1 %v3650_v19  ;;  %v3730_v18 = vld [vmem:[%s5121_s7 + $0x18c] ss:$16 sps:$4 sm:$0xff]   ;;  %v81_v19 = vsub.s32 4, %v4254_v38 }
 0x127   :  { %2119 = vmatprep.subr.bf16.mxu0 %v3655_v20  ;;  %2201 = vmatprep.subr.bf16.mxu1 %v3658_v4  ;;  %v3725_v20 = vld [vmem:[%s5121_s7 + $0x180] ss:$16 sps:$4 sm:$0xff]   ;;  %v3728_v4 = vld [vmem:[%s5121_s7 + $0x188] ss:$16 sps:$4 sm:$0xff]  }
 0x129   :  { %1231 = vmatmul.mubr.bf16.vlgmr.msra.gmra.mrb[8].mxu0 %v361_v22  ;;  %1313 = vmatmul.mubr.bf16.vlgmr.msra.gmra.mrb[8].mxu1 %v361_v22  ;;  %v3736_v22 = vld [vmem:[%s5121_s7 + $0x1ac] ss:$16 sps:$4 sm:$0xff]  }
 0x12a   :  { %2120 = vmatpush1.bf16.msra.mxu0 %v3653_v23  ;;  %2202 = vmatpush1.bf16.msra.mxu1 %v3656_v24  ;;  %v93_v23 = vsub.s32 7, %v4254_v38  ;;  %v82_v24 = vrot.slane %v4262_v40, %v81_v19  ;;  %v3799_v19 = vld [vmem:[%s5121_s7 + $0x304] ss:$16 sps:$4 sm:$0xff]  }
 0x12b   :  { %2121 = vmatprep.subr.bf16.mxu0 %v3661_v26  ;;  %2203 = vmatprep.subr.bf16.mxu1 %v3664_v27  ;;  %v3731_v26 = vld [vmem:[%s5121_s7 + $0x1a0] ss:$16 sps:$4 sm:$0xff]   ;;  %v3734_v27 = vld [vmem:[%s5121_s7 + $0x1a8] ss:$16 sps:$4 sm:$0xff]  }
 0x12c   :  { %2151 = vmatprep.mubr.bf16.mxu0 %v364_v29  ;;  %2233 = vmatprep.mubr.bf16.mxu1 %v364_v29  ;;  %v3739_v29 = vld [vmem:[%s5121_s7 + $0x1c4] ss:$16 sps:$4 sm:$0xff]  }
 0x12e   :  { %2122 = vmatpush1.bf16.msra.mxu0 %v3659_v30  ;;  %2204 = vmatpush1.bf16.msra.mxu1 %v3662_v31  ;;  %v3742_v30 = vld [vmem:[%s5121_s7 + $0x1cc] ss:$16 sps:$4 sm:$0xff]   ;;  %v94_v31 = vrot.slane %v4262_v40, %v93_v23 }
 0x12f   :  { %2123 = vmatprep.subr.bf16.mxu0 %v3667_v32  ;;  %2205 = vmatprep.subr.bf16.mxu1 %v3670_v33  ;;  %v304_v32 = vadd.f32 %v4290_v3, %v82_v24  ;;  %v3737_v33 = vld [vmem:[%s5121_s7 + $0x1c0] ss:$16 sps:$4 sm:$0xff]   ;;  %v3748_v3 = vld [vmem:[%s5121_s7 + $0x1ec] ss:$16 sps:$4 sm:$0xff]  }
 0x130   :  { %v3808_v23 = vld [vmem:[%s5121_s7 + $0x32c] ss:$16 sps:$4 sm:$0xff]   ;;  %v3803_v24 = vld [vmem:[%s5121_s7 + $0x320] ss:$16 sps:$4 sm:$0xff]  }
 0x132   :  { %2124 = vmatpush1.bf16.msra.mxu0 %v3665_v34  ;;  %2206 = vmatpush1.bf16.msra.mxu1 %v3668_v35  ;;  %v3740_v34 = vld [vmem:[%s5121_s7 + $0x1c8] ss:$16 sps:$4 sm:$0xff]   ;;  %v3745_v35 = vld [vmem:[%s5121_s7 + $0x1e4] ss:$16 sps:$4 sm:$0xff]  }
 0x133   :  { %2125 = vmatprep.subr.bf16.mxu0 %v3673_v36  ;;  %2207 = vmatprep.subr.bf16.mxu1 %v3676_v43  ;;  %v347_v36 = vadd.f32 %v4356_v28, %v94_v31  ;;  %v355_v43 = vmax.f32 %v304_v32, 0.0  ;;  %v3754_v28 = vld [vmem:[%s5121_s7 + $0x20c] ss:$16 sps:$4 sm:$0xff]   ;;  %v3812_v31 = vld [vmem:[%s5121_s7 + $0x348] ss:$16 sps:$4 sm:$0xff]  }
 0x134   :  { %v3817_v32 = vld [vmem:[%s5121_s7 + $0x364] ss:$16 sps:$4 sm:$0xff]  }
 0x136   :  { %2126 = vmatpush1.bf16.msra.mxu0 %v3671_v44  ;;  %2208 = vmatpush1.bf16.msra.mxu1 %v3674_v45  ;;  %v3743_v44 = vld [vmem:[%s5121_s7 + $0x1e0] ss:$16 sps:$4 sm:$0xff]   ;;  %v3746_v45 = vld [vmem:[%s5121_s7 + $0x1e8] ss:$16 sps:$4 sm:$0xff]  }
 0x137   :  { %2127 = vmatprep.subr.bf16.mxu0 %v3679_v46  ;;  %2209 = vmatprep.subr.bf16.mxu1 %v3682_v47  ;;  %v3751_v46 = vld [vmem:[%s5121_s7 + $0x204] ss:$16 sps:$4 sm:$0xff]   ;;  %v358_v47 = vmax.f32 %v347_v36, 0.0  ;;  %v3826_v36 = vld [vmem:[%s5121_s7 + $0x38c] ss:$16 sps:$4 sm:$0xff]  }
 0x13a   :  { %2128 = vmatpush1.bf16.msra.mxu0 %v3677_v48  ;;  %2210 = vmatpush1.bf16.msra.mxu1 %v3680_v49  ;;  %v363_v48 = vpack.c.bf16 %v355_v43, %v355_v43  ;;  %v3749_v49 = vld [vmem:[%s5121_s7 + $0x200] ss:$16 sps:$4 sm:$0xff]  }
 0x13b   :  { %2129 = vmatprep.subr.bf16.mxu0 %v3685_v50  ;;  %2211 = vmatprep.subr.bf16.mxu1 %v3688_v52  ;;  %v3752_v50 = vld [vmem:[%s5121_s7 + $0x208] ss:$16 sps:$4 sm:$0xff]   ;;  %v3757_v52 = vld [vmem:[%s5121_s7 + $0x224] ss:$16 sps:$4 sm:$0xff]   ;;  %v3821_v43 = vld [vmem:[%s5121_s7 + $0x380] ss:$16 sps:$4 sm:$0xff]  }
 0x13e   :  { %2130 = vmatpush1.bf16.msra.mxu0 %v3683_v53  ;;  %2212 = vmatpush1.bf16.msra.mxu1 %v3686_v54  ;;  %v3760_v53 = vld [vmem:[%s5121_s7 + $0x22c] ss:$16 sps:$4 sm:$0xff]   ;;  %v366_v54 = vpack.c.bf16 %v358_v47, %v358_v47  ;;  %v3827_v47 = vld [vmem:[%s5121_s7 + $0x3a0] ss:$16 sps:$4 sm:$0xff]  }
 0x13f   :  { %2131 = vmatprep.subr.bf16.mxu0 %v3691_v55  ;;  %2213 = vmatprep.subr.bf16.mxu1 %v3694_v56  ;;  %v3755_v55 = vld [vmem:[%s5121_s7 + $0x220] ss:$16 sps:$4 sm:$0xff]   ;;  %v3758_v56 = vld [vmem:[%s5121_s7 + $0x228] ss:$16 sps:$4 sm:$0xff]  }
 0x142   :  { %2132 = vmatpush1.bf16.msra.mxu0 %v3689_v57  ;;  %2214 = vmatpush1.bf16.msra.mxu1 %v3692_v58  ;;  %v3763_v57 = vld [vmem:[%s5121_s7 + $0x244] ss:$16 sps:$4 sm:$0xff]   ;;  %v3766_v58 = vld [vmem:[%s5121_s7 + $0x24c] ss:$16 sps:$4 sm:$0xff]  }
 0x143   :  { %2133 = vmatprep.subr.bf16.mxu0 %v3697_v59  ;;  %2215 = vmatprep.subr.bf16.mxu1 %v3700_v60  ;;  %v3761_v59 = vld [vmem:[%s5121_s7 + $0x240] ss:$16 sps:$4 sm:$0xff]   ;;  %v3764_v60 = vld [vmem:[%s5121_s7 + $0x248] ss:$16 sps:$4 sm:$0xff]  }
 0x146   :  { %2134 = vmatpush1.bf16.msra.mxu0 %v3695_v61  ;;  %2216 = vmatpush1.bf16.msra.mxu1 %v3698_v63  ;;  %v3769_v61 = vld [vmem:[%s5121_s7 + $0x264] ss:$16 sps:$4 sm:$0xff]   ;;  %v3772_v63 = vld [vmem:[%s5121_s7 + $0x26c] ss:$16 sps:$4 sm:$0xff]  }
 0x147   :  { %2135 = vmatprep.subr.bf16.mxu0 %v3703_v0  ;;  %2217 = vmatprep.subr.bf16.mxu1 %v3706_v1  ;;  %v3767_v0 = vld [vmem:[%s5121_s7 + $0x260] ss:$16 sps:$4 sm:$0xff]   ;;  %v3770_v1 = vld [vmem:[%s5121_s7 + $0x268] ss:$16 sps:$4 sm:$0xff]  }
 0x14a   :  { %2136 = vmatpush1.bf16.msra.mxu0 %v3701_v2  ;;  %2218 = vmatpush1.bf16.msra.mxu1 %v3704_v5  ;;  %v3775_v2 = vld [vmem:[%s5121_s7 + $0x284] ss:$16 sps:$4 sm:$0xff]   ;;  %v3778_v5 = vld [vmem:[%s5121_s7 + $0x28c] ss:$16 sps:$4 sm:$0xff]  }
 0x14b   :  { %2137 = vmatprep.subr.bf16.mxu0 %v3709_v6  ;;  %2219 = vmatprep.subr.bf16.mxu1 %v3712_v7  ;;  %v3773_v6 = vld [vmem:[%s5121_s7 + $0x280] ss:$16 sps:$4 sm:$0xff]   ;;  %v3776_v7 = vld [vmem:[%s5121_s7 + $0x288] ss:$16 sps:$4 sm:$0xff]  }
 0x14e   :  { %2138 = vmatpush1.bf16.msra.mxu0 %v3707_v8  ;;  %2220 = vmatpush1.bf16.msra.mxu1 %v3710_v9  ;;  %v3781_v8 = vld [vmem:[%s5121_s7 + $0x2a4] ss:$16 sps:$4 sm:$0xff]   ;;  %v3784_v9 = vld [vmem:[%s5121_s7 + $0x2ac] ss:$16 sps:$4 sm:$0xff]  }
 0x14f   :  { %2139 = vmatprep.subr.bf16.mxu0 %v3715_v10  ;;  %2221 = vmatprep.subr.bf16.mxu1 %v3718_v11  ;;  %v3779_v10 = vld [vmem:[%s5121_s7 + $0x2a0] ss:$16 sps:$4 sm:$0xff]   ;;  %v3782_v11 = vld [vmem:[%s5121_s7 + $0x2a8] ss:$16 sps:$4 sm:$0xff]  }
 0x152   :  { %2140 = vmatpush1.bf16.msra.mxu0 %v3713_v12  ;;  %2222 = vmatpush1.bf16.msra.mxu1 %v3716_v13  ;;  %v3787_v12 = vld [vmem:[%s5121_s7 + $0x2c4] ss:$16 sps:$4 sm:$0xff]   ;;  %v3790_v13 = vld [vmem:[%s5121_s7 + $0x2cc] ss:$16 sps:$4 sm:$0xff]  }
 0x153   :  { %2141 = vmatprep.subr.bf16.mxu0 %v3721_v14  ;;  %2223 = vmatprep.subr.bf16.mxu1 %v3724_v15  ;;  %v3785_v14 = vld [vmem:[%s5121_s7 + $0x2c0] ss:$16 sps:$4 sm:$0xff]   ;;  %v3788_v15 = vld [vmem:[%s5121_s7 + $0x2c8] ss:$16 sps:$4 sm:$0xff]  }
 0x156   :  { %2142 = vmatpush1.bf16.msra.mxu0 %v3719_v51  ;;  %2224 = vmatpush1.bf16.msra.mxu1 %v3722_v16  ;;  %v3793_v51 = vld [vmem:[%s5121_s7 + $0x2e4] ss:$16 sps:$4 sm:$0xff]   ;;  %v3796_v16 = vld [vmem:[%s5121_s7 + $0x2ec] ss:$16 sps:$4 sm:$0xff]  }
 0x157   :  { %2143 = vmatprep.subr.bf16.mxu0 %v3727_v17  ;;  %2225 = vmatprep.subr.bf16.mxu1 %v3730_v18  ;;  %v3791_v17 = vld [vmem:[%s5121_s7 + $0x2e0] ss:$16 sps:$4 sm:$0xff]   ;;  %v3794_v18 = vld [vmem:[%s5121_s7 + $0x2e8] ss:$16 sps:$4 sm:$0xff]  }
 0x15a   :  { %2144 = vmatpush1.bf16.msra.mxu0 %v3725_v20  ;;  %2226 = vmatpush1.bf16.msra.mxu1 %v3728_v4  ;;  %v3802_v20 = vld [vmem:[%s5121_s7 + $0x30c] ss:$16 sps:$4 sm:$0xff]   ;;  %v3797_v4 = vld [vmem:[%s5121_s7 + $0x300] ss:$16 sps:$4 sm:$0xff]  }
 0x15b   :  { %2145 = vmatprep.subr.bf16.mxu0 %v3733_v21  ;;  %2227 = vmatprep.subr.bf16.mxu1 %v3736_v22  ;;  %v3800_v21 = vld [vmem:[%s5121_s7 + $0x308] ss:$16 sps:$4 sm:$0xff]   ;;  %v3805_v22 = vld [vmem:[%s5121_s7 + $0x324] ss:$16 sps:$4 sm:$0xff]  }
 0x15e   :  { %2146 = vmatpush1.bf16.msra.mxu0 %v3731_v26  ;;  %2228 = vmatpush1.bf16.msra.mxu1 %v3734_v27  ;;  %v3806_v26 = vld [vmem:[%s5121_s7 + $0x328] ss:$16 sps:$4 sm:$0xff]   ;;  %v3811_v27 = vld [vmem:[%s5121_s7 + $0x344] ss:$16 sps:$4 sm:$0xff]  }
 0x15f   :  { %2147 = vmatprep.subr.bf16.mxu0 %v3739_v29  ;;  %2229 = vmatprep.subr.bf16.mxu1 %v3742_v30  ;;  %v3814_v29 = vld [vmem:[%s5121_s7 + $0x34c] ss:$16 sps:$4 sm:$0xff]   ;;  %v3809_v30 = vld [vmem:[%s5121_s7 + $0x340] ss:$16 sps:$4 sm:$0xff]  }
 0x162   :  { %2148 = vmatpush1.bf16.msra.mxu0 %v3737_v33  ;;  %2230 = vmatpush1.bf16.msra.mxu1 %v3740_v34  ;;  %v3820_v33 = vld [vmem:[%s5121_s7 + $0x36c] ss:$16 sps:$4 sm:$0xff]   ;;  %v3815_v34 = vld [vmem:[%s5121_s7 + $0x360] ss:$16 sps:$4 sm:$0xff]  }
 0x163   :  { %2149 = vmatprep.subr.bf16.mxu0 %v3745_v35  ;;  %2231 = vmatprep.subr.bf16.mxu1 %v3748_v3  ;;  %v3818_v35 = vld [vmem:[%s5121_s7 + $0x368] ss:$16 sps:$4 sm:$0xff]   ;;  %v3823_v3 = vld [vmem:[%s5121_s7 + $0x384] ss:$16 sps:$4 sm:$0xff]  }
 0x166   :  { %2150 = vmatpush1.bf16.msra.mxu0 %v3743_v44  ;;  %2232 = vmatpush1.bf16.msra.mxu1 %v3746_v45  ;;  %v3824_v44 = vld [vmem:[%s5121_s7 + $0x388] ss:$16 sps:$4 sm:$0xff]   ;;  %v89_v45 = vsub.s32 6, %v4254_v38 }
 0x167   :  { %2160 = vmatprep.subr.bf16.mxu0 %v3751_v46  ;;  %2242 = vmatprep.subr.bf16.mxu1 %v3754_v28  ;;  %v3829_v46 = vld [vmem:[%s5121_s7 + $0x3a4] ss:$16 sps:$4 sm:$0xff]   ;;  %v3832_v28 = vld [vmem:[%s5121_s7 + $0x3ac] ss:$16 sps:$4 sm:$0xff]   ;;  %v3830_v38 = vld [vmem:[%s5121_s7 + $0x3a8] ss:$16 sps:$4 sm:$0xff]  }
 0x169   :  { %2152 = vmatmul.mubr.bf16.vlgmr.msra.gmra.mrb[12].mxu0 %v363_v48  ;;  %2234 = vmatmul.mubr.bf16.vlgmr.msra.gmra.mrb[12].mxu1 %v363_v48  ;;  %v90_v48 = vrot.slane %v4262_v40, %v89_v45  ;;  %v3836_v40 = vld [vmem:[%s5121_s7 + $0x3c8] ss:$16 sps:$4 sm:$0xff]   ;;  %v4983_v45 = vld [vmem:[%s5120_s6] sm:$0xf] }
 0x16a   :  { %2161 = vmatpush1.bf16.msra.mxu0 %v3749_v49  ;;  %2243 = vmatpush1.bf16.msra.mxu1 %v3752_v50  ;;  %v3835_v49 = vld [vmem:[%s5121_s7 + $0x3c4] ss:$16 sps:$4 sm:$0xff]   ;;  %v3838_v50 = vld [vmem:[%s5121_s7 + $0x3cc] ss:$16 sps:$4 sm:$0xff]  }
 0x16b   :  { %2162 = vmatprep.subr.bf16.mxu0 %v3757_v52  ;;  %2244 = vmatprep.subr.bf16.mxu1 %v3760_v53  ;;  %v3833_v52 = vld [vmem:[%s5121_s7 + $0x3c0] ss:$16 sps:$4 sm:$0xff]   ;;  %v345_v53 = vadd.f32 %v4348_v25, %v90_v48  ;;  %v3842_v25 = vld [vmem:[%s5121_s7 + $0x3e8] ss:$16 sps:$4 sm:$0xff]  }
 0x16c   :  { %2192 = vmatprep.mubr.bf16.mxu0 %v366_v54  ;;  %2274 = vmatprep.mubr.bf16.mxu1 %v366_v54  ;;  %v3841_v54 = vld [vmem:[%s5121_s7 + $0x3e4] ss:$16 sps:$4 sm:$0xff]  }
 0x16e   :  { %2163 = vmatpush1.bf16.msra.mxu0 %v3755_v55  ;;  %2245 = vmatpush1.bf16.msra.mxu1 %v3758_v56  ;;  %v3844_v55 = vld [vmem:[%s5121_s7 + $0x3ec] ss:$16 sps:$4 sm:$0xff]   ;;  %v3839_v56 = vld [vmem:[%s5121_s7 + $0x3e0] ss:$16 sps:$4 sm:$0xff]  }
 0x16f   :  { %2164 = vmatprep.subr.bf16.mxu0 %v3763_v57  ;;  %2246 = vmatprep.subr.bf16.mxu1 %v3766_v58  ;;  %v357_v57 = vmax.f32 %v345_v53, 0.0  ;;  %v3845_v58 = vld [vmem:[%s5124_s10 + $0x40] sm:$0xff]  }
 0x172   :  { %2165 = vmatpush1.bf16.msra.mxu0 %v3761_v59  ;;  %2247 = vmatpush1.bf16.msra.mxu1 %v3764_v60  ;;  %v3846_v59 = vld [vmem:[%s5124_s10 + $0xc0] sm:$0xff]  }
 0x173   :  { %2166 = vmatprep.subr.bf16.mxu0 %v3769_v61  ;;  %2248 = vmatprep.subr.bf16.mxu1 %v3772_v63  ;;  %v3847_v60 = vld [vmem:[%s5124_s10] sm:$0xff]   ;;  %v365_v63 = vpack.c.bf16 %v357_v57, %v357_v57 }
 0x174   :  { %v3848_v61 = vld [vmem:[%s5124_s10 + $0x80] sm:$0xff]  }
 0x176   :  { %2167 = vmatpush1.bf16.msra.mxu0 %v3767_v0  ;;  %2249 = vmatpush1.bf16.msra.mxu1 %v3770_v1  ;;  %v3849_v0 = vld [vmem:[%s5124_s10 + $0x48] sm:$0xff]  }
 0x177   :  { %2168 = vmatprep.subr.bf16.mxu0 %v3775_v2  ;;  %2250 = vmatprep.subr.bf16.mxu1 %v3778_v5  ;;  %v3850_v1 = vld [vmem:[%s5124_s10 + $0xc8] sm:$0xff]  }
 0x178   :  { %v3851_v2 = vld [vmem:[%s5124_s10 + $0x8] sm:$0xff]  }
 0x179   :  { %v3852_v5 = vld [vmem:[%s5124_s10 + $0x88] sm:$0xff]  }
 0x17a   :  { %2169 = vmatpush1.bf16.msra.mxu0 %v3773_v6  ;;  %2251 = vmatpush1.bf16.msra.mxu1 %v3776_v7  ;;  %v3853_v6 = vld [vmem:[%s5124_s10 + $0x50] sm:$0xff]  }
 0x17b   :  { %2170 = vmatprep.subr.bf16.mxu0 %v3781_v8  ;;  %2252 = vmatprep.subr.bf16.mxu1 %v3784_v9  ;;  %v3854_v7 = vld [vmem:[%s5124_s10 + $0xd0] sm:$0xff]  }
 0x17c   :  { %v3855_v8 = vld [vmem:[%s5124_s10 + $0x10] sm:$0xff]  }
 0x17d   :  { %v3856_v9 = vld [vmem:[%s5124_s10 + $0x90] sm:$0xff]  }
 0x17e   :  { %2171 = vmatpush1.bf16.msra.mxu0 %v3779_v10  ;;  %2253 = vmatpush1.bf16.msra.mxu1 %v3782_v11  ;;  %v3857_v10 = vld [vmem:[%s5124_s10 + $0x58] sm:$0xff]  }
 0x17f   :  { %2172 = vmatprep.subr.bf16.mxu0 %v3787_v12  ;;  %2254 = vmatprep.subr.bf16.mxu1 %v3790_v13  ;;  %v3858_v11 = vld [vmem:[%s5124_s10 + $0xd8] sm:$0xff]  }
 0x180   :  { %v3859_v12 = vld [vmem:[%s5124_s10 + $0x18] sm:$0xff]  }
 0x181   :  { %v3860_v13 = vld [vmem:[%s5124_s10 + $0x98] sm:$0xff]  }
 0x182   :  { %2173 = vmatpush1.bf16.msra.mxu0 %v3785_v14  ;;  %2255 = vmatpush1.bf16.msra.mxu1 %v3788_v15  ;;  %v3861_v14 = vld [vmem:[%s5124_s10 + $0x60] sm:$0xff]  }
 0x183   :  { %2174 = vmatprep.subr.bf16.mxu0 %v3793_v51  ;;  %2256 = vmatprep.subr.bf16.mxu1 %v3796_v16  ;;  %v3862_v15 = vld [vmem:[%s5124_s10 + $0xe0] sm:$0xff]  }
 0x184   :  { %v3863_v51 = vld [vmem:[%s5124_s10 + $0x20] sm:$0xff]  }
 0x185   :  { %v3864_v16 = vld [vmem:[%s5124_s10 + $0xa0] sm:$0xff]  }
 0x186   :  { %2175 = vmatpush1.bf16.msra.mxu0 %v3791_v17  ;;  %2257 = vmatpush1.bf16.msra.mxu1 %v3794_v18  ;;  %v3865_v17 = vld [vmem:[%s5124_s10 + $0x68] sm:$0xff]  }
 0x187   :  { %2176 = vmatprep.subr.bf16.mxu0 %v3799_v19  ;;  %2258 = vmatprep.subr.bf16.mxu1 %v3802_v20  ;;  %v3866_v18 = vld [vmem:[%s5124_s10 + $0xe8] sm:$0xff]  }
 0x188   :  { %v3867_v19 = vld [vmem:[%s5124_s10 + $0x28] sm:$0xff]  }
 0x189   :  { %v3868_v20 = vld [vmem:[%s5124_s10 + $0xa8] sm:$0xff]  }
 0x18a   :  { %2177 = vmatpush1.bf16.msra.mxu0 %v3797_v4  ;;  %2259 = vmatpush1.bf16.msra.mxu1 %v3800_v21  ;;  %v3869_v4 = vld [vmem:[%s5124_s10 + $0x70] sm:$0xff]  }
 0x18b   :  { %2178 = vmatprep.subr.bf16.mxu0 %v3805_v22  ;;  %2260 = vmatprep.subr.bf16.mxu1 %v3808_v23  ;;  %v3870_v21 = vld [vmem:[%s5124_s10 + $0xf0] sm:$0xff]  }
 0x18c   :  { %v3871_v22 = vld [vmem:[%s5124_s10 + $0x30] sm:$0xff]  }
 0x18d   :  { %v3872_v23 = vld [vmem:[%s5124_s10 + $0xb0] sm:$0xff]  }
 0x18e   :  { %2179 = vmatpush1.bf16.msra.mxu0 %v3803_v24  ;;  %2261 = vmatpush1.bf16.msra.mxu1 %v3806_v26 }
 0x18f   :  { %2180 = vmatprep.subr.bf16.mxu0 %v3811_v27  ;;  %2262 = vmatprep.subr.bf16.mxu1 %v3814_v29 }
 0x192   :  { %2181 = vmatpush1.bf16.msra.mxu0 %v3809_v30  ;;  %2263 = vmatpush1.bf16.msra.mxu1 %v3812_v31 }
 0x193   :  { %2182 = vmatprep.subr.bf16.mxu0 %v3817_v32  ;;  %2264 = vmatprep.subr.bf16.mxu1 %v3820_v33  ;;  %v3873_v32 = vld [vmem:[%s5124_s10 + $0x78] sm:$0xff]  }
 0x194   :  { %v3874_v33 = vld [vmem:[%s5124_s10 + $0xf8] sm:$0xff]  }
 0x196   :  { %2183 = vmatpush1.bf16.msra.mxu0 %v3815_v34  ;;  %2265 = vmatpush1.bf16.msra.mxu1 %v3818_v35 }
 0x197   :  { %2184 = vmatprep.subr.bf16.mxu0 %v3823_v3  ;;  %2266 = vmatprep.subr.bf16.mxu1 %v3826_v36  ;;  %v3875_v3 = vld [vmem:[%s5124_s10 + $0x38] sm:$0xff]  }
 0x198   :  { %v3876_v36 = vld [vmem:[%s5124_s10 + $0xb8] sm:$0xff]  }
 0x19a   :  { %2185 = vmatpush1.bf16.msra.mxu0 %v3821_v43  ;;  %2267 = vmatpush1.bf16.msra.mxu1 %v3824_v44  ;;  %v3877_v43 = vld [vmem:[%s5123_s9 + $0x40] sm:$0xff]  }
 0x19b   :  { %2186 = vmatprep.subr.bf16.mxu0 %v3829_v46  ;;  %2268 = vmatprep.subr.bf16.mxu1 %v3832_v28  ;;  %v3878_v44 = vld [vmem:[%s5123_s9 + $0xc0] sm:$0xff]   ;;  %v504_v28 = vrot.slane %v4983_v45, %v4265_v41 }
 0x19c   :  { %v1457_v46 = vld [vmem:[%s5122_s8] sm:$0xf] }
 0x19d   :  { %v1470_v48 = vrot.slane %v1457_v46, %v4431_v62 }
 0x19e   :  { %2187 = vmatpush1.bf16.msra.mxu0 %v3827_v47  ;;  %2269 = vmatpush1.bf16.msra.mxu1 %v3830_v38  ;;  %v512_v47 = vrot.slane %v4983_v45, %v4268_v42  ;;  %v1462_v38 = vrot.slane %v1457_v46, %v4257_v39 }
 0x19f   :  { %2188 = vmatprep.subr.bf16.mxu0 %v3835_v49  ;;  %2270 = vmatprep.subr.bf16.mxu1 %v3838_v50  ;;  %v1466_v49 = vrot.slane %v1457_v46, %v4265_v41  ;;  %v1474_v50 = vrot.slane %v1457_v46, %v4268_v42  ;;  %v3902_v46 = vld [vmem:[%s5123_s9 + $0xf0] sm:$0xff]  }
 0x1a2   :  { %2189 = vmatpush1.bf16.msra.mxu0 %v3833_v52  ;;  %2271 = vmatpush1.bf16.msra.mxu1 %v3836_v40 }
 0x1a3   :  { %2190 = vmatprep.subr.bf16.mxu0 %v3841_v54  ;;  %2272 = vmatprep.subr.bf16.mxu1 %v3844_v55 }
 0x1a6   :  { %2191 = vmatpush1.bf16.msra.mxu0 %v3839_v56  ;;  %2273 = vmatpush1.bf16.msra.mxu1 %v3842_v25 }
 0x1a7   :  { %3347 = vmatprep.subr.bf16.mxu0 %v3845_v58  ;;  %3369 = vmatprep.subr.bf16.mxu1 %v3846_v59 }
 0x1a9   :  { %2193 = vmatmul.mubr.bf16.vlgmr.msra.gmra.mrb[12].mxu0 %v365_v63  ;;  %2275 = vmatmul.mubr.bf16.vlgmr.msra.gmra.mrb[12].mxu1 %v365_v63 }
 0x1aa   :  { %3348 = vmatpush3.bf16.msra.mxu0 %v3847_v60  ;;  %3370 = vmatpush3.bf16.msra.mxu1 %v3848_v61 }
 0x1ab   :  { %3349 = vmatprep.subr.bf16.mxu0 %v3849_v0  ;;  %3371 = vmatprep.subr.bf16.mxu1 %v3850_v1 }
 0x1ae   :  { %3350 = vmatpush3.bf16.msra.mxu0 %v3851_v2  ;;  %3372 = vmatpush3.bf16.msra.mxu1 %v3852_v5 }
 0x1af   :  { %3351 = vmatprep.subr.bf16.mxu0 %v3853_v6  ;;  %3373 = vmatprep.subr.bf16.mxu1 %v3854_v7 }
 0x1b2   :  { %3352 = vmatpush3.bf16.msra.mxu0 %v3855_v8  ;;  %3374 = vmatpush3.bf16.msra.mxu1 %v3856_v9  ;;  %v3879_v9 = vld [vmem:[%s5123_s9] sm:$0xff]  }
 0x1b3   :  { %3353 = vmatprep.subr.bf16.mxu0 %v3857_v10  ;;  %3375 = vmatprep.subr.bf16.mxu1 %v3858_v11  ;;  %v3880_v10 = vld [vmem:[%s5123_s9 + $0x80] sm:$0xff]  }
 0x1b6   :  { %3354 = vmatpush3.bf16.msra.mxu0 %v3859_v12  ;;  %3376 = vmatpush3.bf16.msra.mxu1 %v3860_v13  ;;  %v3881_v13 = vld [vmem:[%s5123_s9 + $0x48] sm:$0xff]  }
 0x1b7   :  { %3355 = vmatprep.subr.bf16.mxu0 %v3861_v14  ;;  %3377 = vmatprep.subr.bf16.mxu1 %v3862_v15  ;;  %v3882_v14 = vld [vmem:[%s5123_s9 + $0xc8] sm:$0xff]  }
 0x1ba   :  { %3356 = vmatpush3.bf16.msra.mxu0 %v3863_v51  ;;  %3378 = vmatpush3.bf16.msra.mxu1 %v3864_v16  ;;  %v3883_v16 = vld [vmem:[%s5123_s9 + $0x8] sm:$0xff]  }
 0x1bb   :  { %3357 = vmatprep.subr.bf16.mxu0 %v3865_v17  ;;  %3379 = vmatprep.subr.bf16.mxu1 %v3866_v18  ;;  %v3884_v17 = vld [vmem:[%s5123_s9 + $0x88] sm:$0xff]   ;;  %v3885_v18 = vld [vmem:[%s5123_s9 + $0x50] sm:$0xff]  }
 0x1be   :  { %3358 = vmatpush3.bf16.msra.mxu0 %v3867_v19  ;;  %3380 = vmatpush3.bf16.msra.mxu1 %v3868_v20  ;;  %v3886_v19 = vld [vmem:[%s5123_s9 + $0xd0] sm:$0xff]  }
 0x1bf   :  { %3359 = vmatprep.subr.bf16.mxu0 %v3869_v4  ;;  %3381 = vmatprep.subr.bf16.mxu1 %v3870_v21  ;;  %v3887_v20 = vld [vmem:[%s5123_s9 + $0x10] sm:$0xff]   ;;  %v3889_v21 = vld [vmem:[%s5123_s9 + $0x58] sm:$0xff]  }
 0x1c0   :  { %v3888_v4 = vld [vmem:[%s5123_s9 + $0x90] sm:$0xff]  }
 0x1c2   :  { %3360 = vmatpush3.bf16.msra.mxu0 %v3871_v22  ;;  %3382 = vmatpush3.bf16.msra.mxu1 %v3872_v23  ;;  %v3890_v22 = vld [vmem:[%s5123_s9 + $0xd8] sm:$0xff]  }
 0x1c3   :  { %3361 = vmatprep.subr.bf16.mxu0 %v3873_v32  ;;  %3383 = vmatprep.subr.bf16.mxu1 %v3874_v33  ;;  %v3891_v23 = vld [vmem:[%s5123_s9 + $0x18] sm:$0xff]   ;;  %v3896_v32 = vld [vmem:[%s5123_s9 + $0xa0] sm:$0xff]   ;;  %v3897_v33 = vld [vmem:[%s5123_s9 + $0x68] sm:$0xff]  }
 0x1c6   :  { %3362 = vmatpush3.bf16.msra.mxu0 %v3875_v3  ;;  %3384 = vmatpush3.bf16.msra.mxu1 %v3876_v36  ;;  %v3900_v3 = vld [vmem:[%s5123_s9 + $0xa8] sm:$0xff]   ;;  %v500_v36 = vrot.slane %v4983_v45, %v4257_v39  ;;  %v3904_v39 = vld [vmem:[%s5123_s9 + $0xb0] sm:$0xff]  }
 0x1c7   :  { %3391 = vmatprep.subr.bf16.mxu0 %v3877_v43  ;;  %3413 = vmatprep.subr.bf16.mxu1 %v3878_v44  ;;  %v508_v43 = vrot.slane %v4983_v45, %v4431_v62  ;;  %v3901_v44 = vld [vmem:[%s5123_s9 + $0x70] sm:$0xff]  }
 0x1fc   :  { %v4958_v24 = vpop.f32.mrb[8].mxu0  ;;  %v4960_v26 = vpop.f32.mrb[8].mxu1 }
 0x1fd   :  { %v1234_v27 = vpop.f32.mrb[9].mxu0  ;;  %v1316_v29 = vpop.f32.mrb[9].mxu1  ;;  %v3435_v62 = vadd.f32 %v4958_v24, %v500_v36  ;;  %v3437_v45 = vadd.f32 %v4960_v26, %v508_v43  ;;  %v3908_v24 = vld [vmem:[%s5123_s9 + $0xb8] sm:$0xff]  }
 0x1fe   :  { %v1236_v30 = vpop.f32.mrb[10].mxu0  ;;  %v1318_v31 = vpop.f32.mrb[10].mxu1  ;;  %v3436_v53 = vadd.f32 %v1234_v27, %v504_v28  ;;  %v3438_v54 = vadd.f32 %v1316_v29, %v512_v47  ;;  %v3892_v27 = vld [vmem:[%s5123_s9 + $0x98] sm:$0xff]   ;;  %v3893_v29 = vld [vmem:[%s5123_s9 + $0x60] sm:$0xff]   ;;  %v3903_v28 = vld [vmem:[%s5123_s9 + $0x30] sm:$0xff]  }
 0x1ff   :  { %v1237_v34 = vpop.f32.mrb[11].mxu0  ;;  %v1319_v35 = vpop.f32.mrb[11].mxu1  ;;  %v3894_v30 = vld [vmem:[%s5123_s9 + $0xe0] sm:$0xff]   ;;  %v3905_v47 = vld [vmem:[%s5123_s9 + $0x78] sm:$0xff]   ;;  %v1321_v26 = vmax.f32 %v3435_v62, 0.0 }
 0x200   :  { %v1322_v6 = vmax.f32 %v3436_v53, 0.0  ;;  %v1324_v42 = vmax.f32 %v3438_v54, 0.0  ;;  %v3895_v31 = vld [vmem:[%s5123_s9 + $0x20] sm:$0xff]   ;;  %v3898_v34 = vld [vmem:[%s5123_s9 + $0xe8] sm:$0xff]  }
 0x201   :  { %v3899_v35 = vld [vmem:[%s5123_s9 + $0x28] sm:$0xff]  }
 0x202   :  { %v1326_v15 = vpack.c.bf16 %v1322_v6, %v1322_v6  ;;  %v1328_v51 = vpack.c.bf16 %v1324_v42, %v1324_v42 }
 0x27c   :  { %v2194_v52 = vpop.f32.mrb[12].mxu0  ;;  %v2276_v40 = vpop.f32.mrb[12].mxu1 }
 0x27d   :  { %v3439_v55 = vadd.f32 %v2194_v52, %v1462_v38  ;;  %v3441_v56 = vadd.f32 %v2276_v40, %v1470_v48  ;;  %v2196_v25 = vpop.f32.mrb[13].mxu0  ;;  %v2278_v57 = vpop.f32.mrb[13].mxu1  ;;  %v3906_v38 = vld [vmem:[%s5123_s9 + $0xf8] sm:$0xff]  }
 0x27e   :  { %v3440_v58 = vadd.f32 %v2196_v25, %v1466_v49  ;;  %v3442_v59 = vadd.f32 %v2278_v57, %v1474_v50  ;;  %v2198_v60 = vpop.f32.mrb[14].mxu0  ;;  %v2280_v61 = vpop.f32.mrb[14].mxu1  ;;  %v3907_v48 = vld [vmem:[%s5123_s9 + $0x38] sm:$0xff]   ;;  %v1323_v49 = vmax.f32 %v3437_v45, 0.0  ;;  %v1325_v50 = vpack.c.bf16 %v1321_v26, %v1321_v26 }
 0x27f   :  { %v2283_v63 = vmax.f32 %v3439_v55, 0.0  ;;  %v2285_v0 = vmax.f32 %v3441_v56, 0.0  ;;  %v2199_v1 = vpop.f32.mrb[15].mxu0  ;;  %v2281_v2 = vpop.f32.mrb[15].mxu1 }
 0x280   :  { %v2284_v5 = vmax.f32 %v3440_v58, 0.0  ;;  %v2286_v41 = vmax.f32 %v3442_v59, 0.0  ;;  %v1327_v52 = vpack.c.bf16 %v1323_v49, %v1323_v49 }
 0x281   :  { %v2287_v11 = vpack.c.bf16 %v2283_v63, %v2283_v63  ;;  %v2289_v12 = vpack.c.bf16 %v2285_v0, %v2285_v0 }
 0x282   :  { %v2288_v7 = vpack.c.bf16 %v2284_v5, %v2284_v5  ;;  %v2290_v8 = vpack.c.bf16 %v2286_v41, %v2286_v41 }
 0x284   :  { %2643 = vmatprep.mubr.bf16.mxu0 %v2288_v7  ;;  %2683 = vmatprep.mubr.bf16.mxu1 %v2290_v8 }
 0x285   :  { %2644 = vmatmul.mubr.bf16.vlgmr.msra.gmra.mrb[16].mxu0 %v2287_v11  ;;  %2684 = vmatmul.mubr.bf16.vlgmr.msra.gmra.mrb[16].mxu1 %v2289_v12  ;;  %v2971_v12 = vld [vmem:[%s5115_s1] sm:$0xff] }
 0x286   :  { %3392 = vmatpush3.bf16.msra.mxu0 %v3879_v9  ;;  %3414 = vmatpush3.bf16.msra.mxu1 %v3880_v10  ;;  %v3345_v10 = vld [vmem:[%s5125_s11] ss:$0 sm:$0xff]  ;;  %s2997_s11 = sshll.u32 %s3934_s14, 4  ;;  %s2998_s11 = int_to_ptr.vmem [resolvable:$true] %s2997_s11 }
 0x287   :  { %2915 = vmatprep.mubr.bf16.mxu0 %v1326_v15  ;;  %2955 = vmatprep.mubr.bf16.mxu1 %v1328_v51  ;;  %v3346_v15 = vld [vmem:[%s5116_s2] ss:$0 sm:$0xff]  ;;  %s3909_s1 = scalar_lea.vmem %s2998_s11, 128  ;;  %p3914_p1 = scmp.lt.s32.totalorder %s2998_s11, %s2998_s11 }
 0x288   :  { %3393 = vmatprep.subr.bf16.mxu0 %v3881_v13  ;;  %3415 = vmatprep.subr.bf16.mxu1 %v3882_v14  ;;  %p3910_p0 = scmp.ne.s32.totalorder %s2998_s11, %s3909_s1  ;;  %p3915_p2 = scmp.lt.s32.totalorder %s3909_s1, %s3909_s1 }
 0x28a   :  { %3394 = vmatpush3.bf16.msra.mxu0 %v3883_v16  ;;  %3416 = vmatpush3.bf16.msra.mxu1 %v3884_v17  ;;  %v2987_v17 = vand.u32 127, %v63_v37  ;;  %p3916_p3 = por %p3915_p2, %p3914_p1 }
 0x28b   :  { %3395 = vmatprep.subr.bf16.mxu0 %v3885_v18  ;;  %3417 = vmatprep.subr.bf16.mxu1 %v3886_v19 }
 0x28c   :  { %vm2988_vm1 = vcmp.eq.s32.totalorder %v2987_v17, 5  ;;  %p3917_p4 = pnand %p3916_p3, %p3910_p0 }
 0x28e   :  { %3396 = vmatpush3.bf16.msra.mxu0 %v3887_v20  ;;  %3418 = vmatpush3.bf16.msra.mxu1 %v3888_v4 }
 0x28f   :  { %3397 = vmatprep.subr.bf16.mxu0 %v3889_v21  ;;  %3419 = vmatprep.subr.bf16.mxu1 %v3890_v22 }
 0x292   :  { %3398 = vmatpush3.bf16.msra.mxu0 %v3891_v23  ;;  %3420 = vmatpush3.bf16.msra.mxu1 %v3892_v27 }
 0x293   :  { %3399 = vmatprep.subr.bf16.mxu0 %v3893_v29  ;;  %3421 = vmatprep.subr.bf16.mxu1 %v3894_v30 }
 0x296   :  { %3400 = vmatpush3.bf16.msra.mxu0 %v3895_v31  ;;  %3422 = vmatpush3.bf16.msra.mxu1 %v3896_v32 }
 0x297   :  { %3401 = vmatprep.subr.bf16.mxu0 %v3897_v33  ;;  %3423 = vmatprep.subr.bf16.mxu1 %v3898_v34 }
 0x29a   :  { %3402 = vmatpush3.bf16.msra.mxu0 %v3899_v35  ;;  %3424 = vmatpush3.bf16.msra.mxu1 %v3900_v3 }
 0x29b   :  { %3403 = vmatprep.subr.bf16.mxu0 %v3901_v44  ;;  %3425 = vmatprep.subr.bf16.mxu1 %v3902_v46 }
 0x29e   :  { %3404 = vmatpush3.bf16.msra.mxu0 %v3903_v28  ;;  %3426 = vmatpush3.bf16.msra.mxu1 %v3904_v39 }
 0x29f   :  { %3405 = vmatprep.subr.bf16.mxu0 %v3905_v47  ;;  %3427 = vmatprep.subr.bf16.mxu1 %v3906_v38 }
 0x2a2   :  { %3406 = vmatpush3.bf16.msra.mxu0 %v3907_v48  ;;  %3428 = vmatpush3.bf16.msra.mxu1 %v3908_v24 }
 0x2a5   :  { %2916 = vmatmul.mubr.bf16.vlgmr.msra.gmra.mrb[20].mxu0 %v1325_v50  ;;  %2956 = vmatmul.mubr.bf16.vlgmr.msra.gmra.mrb[20].mxu1 %v1327_v52 }
 0x358   :  { %v3363_v40 = vpop.f32.mrb[16].mxu0  ;;  %v3385_v53 = vpop.f32.mrb[16].mxu1 }
 0x359   :  { %v3364_v54 = vpop.f32.mrb[17].mxu0  ;;  %v3386_v55 = vpop.f32.mrb[17].mxu1 }
 0x35a   :  { %v3365_v56 = vadd.f32 %v3364_v54, %v3363_v40  ;;  %v3387_v25 = vadd.f32 %v3386_v55, %v3385_v53  ;;  %v3366_v57 = vpop.f32.mrb[18].mxu0  ;;  %v3388_v58 = vpop.f32.mrb[18].mxu1 }
 0x35b   :  { %v3367_v59 = vpop.f32.mrb[19].mxu0  ;;  %v3389_v60 = vpop.f32.mrb[19].mxu1 }
 0x35c   :  { %v2686_v61 = vadd.f32 %v3387_v25, %v3365_v56 }
 0x378   :  { %v3407_v63 = vpop.f32.mrb[20].mxu0  ;;  %v3429_v0 = vpop.f32.mrb[20].mxu1 }
 0x379   :  { %v3408_v1 = vpop.f32.mrb[21].mxu0  ;;  %v3430_v2 = vpop.f32.mrb[21].mxu1 }
 0x37a   :  { %v3409_v5 = vadd.f32 %v3408_v1, %v3407_v63  ;;  %v3431_v41 = vadd.f32 %v3430_v2, %v3429_v0  ;;  %v3410_v6 = vpop.f32.mrb[22].mxu0  ;;  %v3432_v42 = vpop.f32.mrb[22].mxu1 }
 0x37b   :  { %v3411_v7 = vpop.f32.mrb[23].mxu0  ;;  %v3433_v8 = vpop.f32.mrb[23].mxu1 }
 0x37c   :  { %v2918_v9 = vadd.f32 %v3409_v5, %v2686_v61 }
 0x37e   :  { %v2958_v11 = vadd.f32 %v3431_v41, %v2918_v9 }
 0x380   :  { %v2970_v13 = vadd.f32 %v3345_v10, %v2958_v11 }
 0x382   :  { %v2972_v14 = vsub.f32 %v2971_v12, %v2970_v13 }
 0x384   :  { %v2973_v51 = vmul.f32 %v2972_v14, %v2972_v14 }
 0x386   :  { %v2981_v16 = vmul.f32 %v3346_v15, %v2973_v51 }
 0x388   :  { %2982 = vadd.xlane.f32.xlu0 %v2981_v16 }
 0x415   :  { %v2983_v18 = vpop.xlane.xlu0 %2982 }
 0x416   :  { %v2984_v19 = vmul.f32 0.5, %v2983_v18 }
 0x418   :  { %v2985_v20 = vsub.f32 -0.9031654, %v2984_v19 }
 0x41a   :  { %v2989_v4 = vsel %vm2988_vm1, %v2985_v20, %v2970_v13 }
 0x41b   :  { %2990 = vst [vmem:[#allocation2] sm:$0xff] %v2989_v4 }
 0x41c   :  { %3920 = shalt.err (!%p3917_p4)
}
 0x41d   :  { %s3921_s15 = scalar_lea.hbm %s5126_s12, 128 }
 0x41e   :  { %p3922_p5 = scmp.ne.s32.totalorder %s5126_s12, %s3921_s15  ;;  %p3925_p6 = scmp.lt.u32.totalorder %s3921_s15, %s5126_s12 }
 0x420   :  { %p3927_p7 = pnand %p3925_p6, %p3922_p5 }
 0x422   :  { %3930 = shalt.err (!%p3927_p7)
}
 0x423   :  { %3000 = dma.vmem_to_hbm [thread:$0]  %s2998_s11, 128, %s5126_s12, [#allocation3]  }
 0x424   :  { %3931 = dma.done.wait [#allocation3], 128  }
 0x425   :  { %3932 = vsyncadd [#allocation3], 4294967168 }
 0x426   :  { %3004 = vsyncpa [#allocation3], 1 }

</bundles_post_ra>
